<compile_context>
chip_gen: v7x
topology: tpu7x:2x2x1
jax: 0.10.0
libtpu: 0.0.40
codegen_flags: <defaults>
</compile_context>

<pallas_src>
import functools

import jax
import jax.numpy as jnp
from jax import lax
from jax.experimental import pallas as pl
from jax.experimental.pallas import tpu as pltpu

EPS = 1e-5                      # torch.nn.LayerNorm default eps
PARAM_DTYPE = jnp.bfloat16      # matmul weight storage dtype
COMPUTE_DTYPE = jnp.bfloat16    # residual-stream / activation dtype
NEG_INF = -1e30                 # finite "-inf" (avoids inf-inf NaNs)

WEIGHT_RESIDENT_BYTES = 8 * 1024 * 1024   # keep a weight fully resident below this


# ----------------------------------------------------------------------------
# helpers
# ----------------------------------------------------------------------------
def _vmem_limit_bytes():
    """Generation-aware VMEM limit (~109 MiB on v5e/v6e, ~54 MiB on v7x)."""
    try:
        info = pltpu.get_tpu_info()
        cap = getattr(info, "vmem_capacity_bytes", None)
        if cap:
            return int(cap * 0.85)
    except Exception:
        pass
    return 56 * 1024 * 1024    # conservative (v7x-safe) fallback


_VMEM_LIMIT_BYTES = _vmem_limit_bytes()


def _mosaic_params(*semantics):
    return pltpu.CompilerParams(
        dimension_semantics=semantics,
        vmem_limit_bytes=_VMEM_LIMIT_BYTES,
    )


def _pick_tile(dim, targets):
    """Largest target tile that divides `dim`; else the largest multiple-of-8
    divisor up to max(targets); else the full dim."""
    for t in targets:
        if dim >= t and dim % t == 0:
            return t
    cap = min(dim, max(targets))
    t = cap - cap % 8
    while t >= 8:
        if dim % t == 0:
            return t
        t -= 8
    # TODO(synk): dims that are not a multiple of 8 fall back to one full-dim
    # block (legal but unpipelined); pad upstream if such shapes matter.
    return dim


def _round_up(n, mult):
    return ((n + mult - 1) // mult) * mult


def _vocab_pad(v):
    if v >= 512:
        return _round_up(v, 512)
    if v >= 128:
        return _round_up(v, 128)
    return v


def _layernorm_f32(x, gamma, beta):
    x = x.astype(jnp.float32)
    mean = jnp.mean(x, axis=-1, keepdims=True)
    var = jnp.mean(jnp.square(x - mean), axis=-1, keepdims=True)
    return (x - mean) * lax.rsqrt(var + EPS) * gamma + beta


# ----------------------------------------------------------------------------
# Pallas kernels
# ----------------------------------------------------------------------------
def ln_linear_kernel(x_ref, g_ref, b_ref, w_ref, bias_ref, o_ref, ln_ref, *,
                     apply_gelu):
    """LayerNorm (f32, cached in scratch across N tiles) + Linear [+ GELU]."""
    j = pl.program_id(1)

    @pl.when(j == 0)
    def _():
        ln_ref[...] = _layernorm_f32(
            x_ref[...], g_ref[...], b_ref[...]).astype(ln_ref.dtype)

    acc = jnp.dot(ln_ref[...], w_ref[...], preferred_element_type=jnp.float32)
    acc = acc + bias_ref[...]
    if apply_gelu:
        c = 0.7978845608028654  # sqrt(2/pi), GELU(approximate='tanh')
        acc = 0.5 * acc * (1.0 + jnp.tanh(c * (acc + 0.044715 * acc * acc * acc)))
    o_ref[...] = acc.astype(o_ref.dtype)


def linear_residual_kernel(x_ref, w_ref, bias_ref, res_ref, o_ref, acc_ref):
    """o = residual + x @ W + b, K-tiled with an f32 VMEM accumulator."""
    k = pl.program_id(1)

    @pl.when(k == 0)
    def _():
        acc_ref[...] = res_ref[...].astype(jnp.float32) + bias_ref[...]

    acc_ref[...] += jnp.dot(x_ref[...], w_ref[...],
                            preferred_element_type=jnp.float32)

    @pl.when(k == pl.num_programs(1) - 1)
    def _():
        o_ref[...] = acc_ref[...].astype(o_ref.dtype)


def flash_attn_kernel(q_ref, k_ref, v_ref, o_ref, m_sc, l_sc, acc_sc, *,
                      n_head, head_dim, tq, tkv):
    """Causal flash attention for one (batch, q-block); kv-blocks stream on the
    innermost grid axis with online softmax state in VMEM scratch.

    q_ref: (1, tq, C)   k_ref/v_ref: (1, tkv, C)   o_ref: (1, tq, C)
    m_sc/l_sc: (tq, n_head) f32,  acc_sc: (tq, C) f32.
    """
    iq = pl.program_id(1)
    ikv = pl.program_id(2)
    nkv = pl.num_programs(2)
    scale = 1.0 / (head_dim ** 0.5)

    @pl.when(ikv == 0)
    def _():
        m_sc[...] = jnp.full_like(m_sc, NEG_INF)
        l_sc[...] = jnp.zeros_like(l_sc)
        acc_sc[...] = jnp.zeros_like(acc_sc)

    # Causal skip: this KV block contributes only if its first key position is
    # <= the last query position of the q block.
    @pl.when(ikv * tkv < (iq + 1) * tq)
    def _():
        row = iq * tq + lax.broadcasted_iota(jnp.int32, (tq, tkv), 0)
        col = ikv * tkv + lax.broadcasted_iota(jnp.int32, (tq, tkv), 1)
        causal = col <= row

        for h in range(n_head):                     # static unroll over heads
            hs = slice(h * head_dim, (h + 1) * head_dim)
            q = q_ref[0, :, hs]                     # (tq, hd) bf16
            k = k_ref[0, :, hs]                     # (tkv, hd)
            v = v_ref[0, :, hs]                     # (tkv, hd)

            s = lax.dot_general(q, k, (((1,), (1,)), ((), ())),
                                preferred_element_type=jnp.float32)   # (tq, tkv)
            s = jnp.where(causal, s * scale, NEG_INF)

            m_prev = m_sc[:, h:h + 1]
            l_prev = l_sc[:, h:h + 1]
            m_new = jnp.maximum(m_prev, jnp.max(s, axis=-1, keepdims=True))
            alpha = jnp.exp(m_prev - m_new)
            p = jnp.exp(s - m_new)
            l_sc[:, h:h + 1] = alpha * l_prev + jnp.sum(p, axis=-1, keepdims=True)
            acc_sc[:, hs] = alpha * acc_sc[:, hs] + jnp.dot(
                p.astype(v.dtype), v, preferred_element_type=jnp.float32)
            m_sc[:, h:h + 1] = m_new

    @pl.when(ikv == nkv - 1)
    def _():
        for h in range(n_head):
            hs = slice(h * head_dim, (h + 1) * head_dim)
            o_ref[0, :, hs] = (acc_sc[:, hs] / l_sc[:, h:h + 1]).astype(o_ref.dtype)


# ----------------------------------------------------------------------------
# Pallas wrappers
# ----------------------------------------------------------------------------
def pallas_ln_linear(x, g, b, w, bias, *, gelu=False, m_targets=(512, 256, 128)):
    M, C = x.shape
    N = w.shape[1]
    tm = _pick_tile(M, m_targets)
    # keep the weight resident only if it is small; otherwise tile N
    tn = N if C * N * 2 <= WEIGHT_RESIDENT_BYTES else _pick_tile(N, (512, 256, 128))
    kernel = functools.partial(ln_linear_kernel, apply_gelu=gelu)
    return pl.pallas_call(
        kernel,
        out_shape=jax.ShapeDtypeStruct((M, N), COMPUTE_DTYPE),
        grid=(M // tm, N // tn),
        in_specs=[
            pl.BlockSpec((tm, C), lambda i, j: (i, 0)),   # activation tile
            pl.BlockSpec((1, C), lambda i, j: (0, 0)),    # gamma
            pl.BlockSpec((1, C), lambda i, j: (0, 0)),    # beta
            pl.BlockSpec((C, tn), lambda i, j: (0, j)),   # weight (N-tiled)
            pl.BlockSpec((1, tn), lambda i, j: (0, j)),   # bias
        ],
        out_specs=pl.BlockSpec((tm, tn), lambda i, j: (i, j)),
        scratch_shapes=[pltpu.VMEM((tm, C), COMPUTE_DTYPE)],   # cached LN tile
        compiler_params=_mosaic_params("parallel", "arbitrary"),
    )(x, g.reshape(1, C), b.reshape(1, C), w, bias.reshape(1, N))


def pallas_linear_residual(x, w, bias, res):
    M, K = x.shape
    N = w.shape[1]
    tm = _pick_tile(M, (512, 256, 128))
    tk = K if K * N * 2 <= WEIGHT_RESIDENT_BYTES else _pick_tile(K, (1024, 512, 256))
    return pl.pallas_call(
        linear_residual_kernel,
        out_shape=jax.ShapeDtypeStruct((M, N), COMPUTE_DTYPE),
        grid=(M // tm, K // tk),
        in_specs=[
            pl.BlockSpec((tm, tk), lambda i, k: (i, k)),
            pl.BlockSpec((tk, N), lambda i, k: (k, 0)),   # weight (K-tiled)
            pl.BlockSpec((1, N), lambda i, k: (0, 0)),
            pl.BlockSpec((tm, N), lambda i, k: (i, 0)),   # residual tile
        ],
        out_specs=pl.BlockSpec((tm, N), lambda i, k: (i, 0)),
        scratch_shapes=[pltpu.VMEM((tm, N), jnp.float32)],
        compiler_params=_mosaic_params("parallel", "arbitrary"),
    )(x, w, bias.reshape(1, N), res)


def pallas_causal_attention(qkv, n_head):
    B, T, C3 = qkv.shape
    C = C3 // 3
    hd = C // n_head
    tq = _pick_tile(T, (256, 128))
    tkv = tq
    nq, nkv = T // tq, T // tkv

    if C % 128 == 0:
        # zero-copy column-block views into the fused (B, T, 3C) qkv slab
        q_in, k_in, v_in = qkv, qkv, qkv
        qc, kc, vc = 0, 1, 2
    else:
        # small-model fallback: C is not lane-aligned, split q/k/v in XLA
        q_in = qkv[:, :, :C]
        k_in = qkv[:, :, C:2 * C]
        v_in = qkv[:, :, 2 * C:]
        qc = kc = vc = 0

    kernel = functools.partial(flash_attn_kernel, n_head=n_head, head_dim=hd,
                               tq=tq, tkv=tkv)
    return pl.pallas_call(
        kernel,
        out_shape=jax.ShapeDtypeStruct((B, T, C), COMPUTE_DTYPE),
        grid=(B, nq, nkv),
        in_specs=[
            pl.BlockSpec((1, tq, C), lambda b, i, j, c=qc: (b, i, c)),
            pl.BlockSpec((1, tkv, C), lambda b, i, j, c=kc: (b, j, c)),
            pl.BlockSpec((1, tkv, C), lambda b, i, j, c=vc: (b, j, c)),
        ],
        out_specs=pl.BlockSpec((1, tq, C), lambda b, i, j: (b, i, 0)),
        scratch_shapes=[
            pltpu.VMEM((tq, n_head), jnp.float32),   # running max per head
            pltpu.VMEM((tq, n_head), jnp.float32),   # running denom per head
            pltpu.VMEM((tq, C), jnp.float32),        # output accumulator
        ],
        # TODO(synk): fully-masked KV blocks are skipped for compute but their
        # tiles are still DMA'd; a scalar-prefetched block map would halve that.
        compiler_params=_mosaic_params("parallel", "parallel", "arbitrary"),
    )(q_in, k_in, v_in)


def pallas_ln_lm_head(x, g, b, w, vocab_size):
    """Final LayerNorm fused with the tied lm_head matmul (bf16 logits)."""
    vpad = w.shape[1]
    zero_bias = jnp.zeros((vpad,), jnp.float32)
    logits = pallas_ln_linear(x, g, b, w, zero_bias, gelu=False,
                              m_targets=(2048, 1024, 512, 256, 128))
    if vpad != vocab_size:
        logits = logits[:, :vocab_size]
    return logits


# ----------------------------------------------------------------------------
# GPT model (params + forward)
# ----------------------------------------------------------------------------
class GPTConfig:
    def __init__(self, block_size=16, vocab_size=128, n_layer=2, n_head=4, n_embd=32):
        self.block_size = block_size
        self.vocab_size = vocab_size
        self.n_layer = n_layer
        self.n_head = n_head
        self.n_embd = n_embd


def init_params(key, cfg):
    std = 0.02
    proj_std = 0.02 * (2 * cfg.n_layer) ** -0.5
    C, V = cfg.n_embd, cfg.vocab_size
    keys = jax.random.split(key, 2 + 4 * cfg.n_layer)
    kit = iter(keys)

    wte_f32 = jax.random.normal(next(kit), (V, C), jnp.float32) * std
    wpe_f32 = jax.random.normal(next(kit), (cfg.block_size, C), jnp.float32) * std

    blocks = []
    for _ in range(cfg.n_layer):
        blocks.append(dict(
            ln1_g=jnp.ones((C,), jnp.float32),
            ln1_b=jnp.zeros((C,), jnp.float32),
            attn_w=(jax.random.normal(next(kit), (C, 3 * C), jnp.float32) * std).astype(PARAM_DTYPE),
            attn_b=jnp.zeros((3 * C,), jnp.float32),
            attn_proj_w=(jax.random.normal(next(kit), (C, C), jnp.float32) * proj_std).astype(PARAM_DTYPE),
            attn_proj_b=jnp.zeros((C,), jnp.float32),
            ln2_g=jnp.ones((C,), jnp.float32),
            ln2_b=jnp.zeros((C,), jnp.float32),
            fc_w=(jax.random.normal(next(kit), (C, 4 * C), jnp.float32) * std).astype(PARAM_DTYPE),
            fc_b=jnp.zeros((4 * C,), jnp.float32),
            mlp_proj_w=(jax.random.normal(next(kit), (4 * C, C), jnp.float32) * proj_std).astype(PARAM_DTYPE),
            mlp_proj_b=jnp.zeros((C,), jnp.float32),
        ))

    # tied lm_head weight: pre-transposed once and vocab-padded so the vocab
    # tile always divides (padded columns are zero and sliced off at the end).
    vpad = _vocab_pad(V)
    lm_head_w = jnp.zeros((C, vpad), jnp.float32).at[:, :V].set(wte_f32.T)

    return dict(
        wte=wte_f32.astype(PARAM_DTYPE),
        wpe=wpe_f32.astype(PARAM_DTYPE),
        lm_head_w=lm_head_w.astype(PARAM_DTYPE),
        blocks=blocks,
        lnf_g=jnp.ones((C,), jnp.float32),
        lnf_b=jnp.zeros((C,), jnp.float32),
    )


def gpt_forward(params, idx, cfg):
    B, T = idx.shape
    C, H = cfg.n_embd, cfg.n_head
    M = B * T

    # embeddings (gather + add is plain-JAX glue)
    tok_emb = jnp.take(params["wte"], idx, axis=0)                 # (B, T, C)
    pos_emb = params["wpe"][:T]                                    # (T, C)
    x = (tok_emb.astype(jnp.float32)
         + pos_emb.astype(jnp.float32)[None, :, :]).astype(COMPUTE_DTYPE)
    x2 = x.reshape(M, C)                                           # residual stream

    for blk in params["blocks"]:
        # --- causal self-attention (LN fused into qkv, residual fused into proj)
        qkv = pallas_ln_linear(x2, blk["ln1_g"], blk["ln1_b"],
                               blk["attn_w"], blk["attn_b"])       # (M, 3C)
        y = pallas_causal_attention(qkv.reshape(B, T, 3 * C), H)   # (B, T, C)
        x2 = pallas_linear_residual(y.reshape(M, C),
                                    blk["attn_proj_w"], blk["attn_proj_b"], x2)

        # --- MLP (LN + fc + GELU fused, residual fused into proj)
        h = pallas_ln_linear(x2, blk["ln2_g"], blk["ln2_b"],
                             blk["fc_w"], blk["fc_b"], gelu=True)  # (M, 4C)
        x2 = pallas_linear_residual(h, blk["mlp_proj_w"], blk["mlp_proj_b"], x2)

    # final LN fused with the tied, vocab-tiled lm_head (bf16 logits)
    logits = pallas_ln_lm_head(x2, params["lnf_g"], params["lnf_b"],
                               params["lm_head_w"], cfg.vocab_size)   # (M, V)
    # TODO(synk): cross-entropy loss path (targets is not None) not implemented;
    # forward returns logits only.
    return logits.reshape(B, T, cfg.vocab_size)


if __name__ == "__main__":
    cfg = GPTConfig(block_size=16, vocab_size=128, n_layer=2, n_head=4, n_embd=32)
    key = jax.random.PRNGKey(0)
    pkey, ikey = jax.random.split(key)
    params = init_params(pkey, cfg)

    B, T = 2, 8
    idx = jax.random.randint(ikey, (B, T), 0, cfg.vocab_size, dtype=jnp.int32)

    fwd = jax.jit(functools.partial(gpt_forward, cfg=cfg))
    logits = fwd(params, idx)
    jax.block_until_ready(logits)

    assert logits.shape == (B, T, cfg.vocab_size)
    assert bool(jnp.all(jnp.isfinite(logits.astype(jnp.float32))))
    print("KERNEL_OK")
</pallas_src>

<mosaic_0001>
module attributes {stable_mosaic.version = 11 : i64} {
  func.func @ln_linear_kernel(%arg0: i32, %arg1: i32, %arg2: memref<16x32xbf16, #tpu.memory_space<vmem>>, %arg3: memref<1x32xf32, #tpu.memory_space<vmem>>, %arg4: memref<1x32xf32, #tpu.memory_space<vmem>>, %arg5: memref<32x96xbf16, #tpu.memory_space<vmem>>, %arg6: memref<1x96xf32, #tpu.memory_space<vmem>>, %arg7: memref<16x96xbf16, #tpu.memory_space<vmem>>, %arg8: memref<16x32xbf16, #tpu.memory_space<vmem>>) attributes {dimension_semantics = [#tpu.dimension_semantics<parallel>, #tpu.dimension_semantics<arbitrary>], iteration_bounds = array<i64: 1, 1>, scalar_prefetch = 0 : i64, scratch_operands = 1 : i64, tpu.core_type = #tpu.core_type<tc>, window_params = [{transform_indices = @transform_0, window_bounds = array<i64: 16, 32>}, {pipeline_mode = #tpu.pipeline_mode<synchronous>, transform_indices = @transform_1, window_bounds = array<i64: 1, 32>}, {pipeline_mode = #tpu.pipeline_mode<synchronous>, transform_indices = @transform_2, window_bounds = array<i64: 1, 32>}, {transform_indices = @transform_3, window_bounds = array<i64: 32, 96>}, {transform_indices = @transform_4, window_bounds = array<i64: 1, 96>}, {transform_indices = @transform_5, window_bounds = array<i64: 16, 96>}]} {
    %c0_i32 = arith.constant 0 : i32
    %0 = arith.cmpi eq, %arg1, %c0_i32 : i32
    %1 = arith.extui %0 : i1 to i32
    %c0_i32_0 = arith.constant 0 : i32
    %2 = arith.cmpi ne, %1, %c0_i32_0 : i32
    scf.if %2 {
      %c0_8 = arith.constant 0 : index
      %c0_9 = arith.constant 0 : index
      %11 = vector.load %arg2[%c0_8, %c0_9] : memref<16x32xbf16, #tpu.memory_space<vmem>>, vector<16x32xbf16>
      %c0_10 = arith.constant 0 : index
      %c0_11 = arith.constant 0 : index
      %12 = vector.load %arg3[%c0_10, %c0_11] : memref<1x32xf32, #tpu.memory_space<vmem>>, vector<1x32xf32>
      %c0_12 = arith.constant 0 : index
      %c0_13 = arith.constant 0 : index
      %13 = vector.load %arg4[%c0_12, %c0_13] : memref<1x32xf32, #tpu.memory_space<vmem>>, vector<1x32xf32>
      %14 = arith.extf %11 : vector<16x32xbf16> to vector<16x32xf32>
      %cst_14 = arith.constant dense<0.000000e+00> : vector<16xf32>
      %15 = vector.multi_reduction <add>, %14, %cst_14 [1] : vector<16x32xf32> to vector<16xf32>
      %16 = vector.shape_cast %15 : vector<16xf32> to vector<16x1xf32>
      %cst_15 = arith.constant 3.200000e+01 : f32
      %17 = vector.broadcast %cst_15 : f32 to vector<16x1xf32>
      %18 = arith.divf %16, %17 : vector<16x1xf32>
      %19 = vector.broadcast %18 : vector<16x1xf32> to vector<16x32xf32>
      %20 = arith.subf %14, %19 : vector<16x32xf32>
      %21 = arith.mulf %20, %20 : vector<16x32xf32>
      %cst_16 = arith.constant dense<0.000000e+00> : vector<16xf32>
      %22 = vector.multi_reduction <add>, %21, %cst_16 [1] : vector<16x32xf32> to vector<16xf32>
      %23 = vector.shape_cast %22 : vector<16xf32> to vector<16x1xf32>
      %cst_17 = arith.constant 3.200000e+01 : f32
      %24 = vector.broadcast %cst_17 : f32 to vector<16x1xf32>
      %25 = arith.divf %23, %24 : vector<16x1xf32>
      %26 = vector.broadcast %18 : vector<16x1xf32> to vector<16x32xf32>
      %27 = arith.subf %14, %26 : vector<16x32xf32>
      %cst_18 = arith.constant 9.99999974E-6 : f32
      %28 = vector.broadcast %cst_18 : f32 to vector<16x1xf32>
      %29 = arith.addf %25, %28 : vector<16x1xf32>
      %30 = math.rsqrt %29 : vector<16x1xf32>
      %31 = vector.broadcast %30 : vector<16x1xf32> to vector<16x32xf32>
      %32 = arith.mulf %27, %31 : vector<16x32xf32>
      %33 = vector.broadcast %12 : vector<1x32xf32> to vector<16x32xf32>
      %34 = arith.mulf %32, %33 : vector<16x32xf32>
      %35 = vector.broadcast %13 : vector<1x32xf32> to vector<16x32xf32>
      %36 = arith.addf %34, %35 : vector<16x32xf32>
      %37 = arith.truncf %36 : vector<16x32xf32> to vector<16x32xbf16>
      %c0_19 = arith.constant 0 : index
      %c0_20 = arith.constant 0 : index
      %38 = vector.load %arg8[%c0_19, %c0_20] : memref<16x32xbf16, #tpu.memory_space<vmem>>, vector<16x32xbf16>
      tpu.vector_store %arg8[%c0_19, %c0_20], %37 {strides = array<i32>} : memref<16x32xbf16, #tpu.memory_space<vmem>>, vector<16x32xbf16>,
    } else {
    }
    %c0 = arith.constant 0 : index
    %c0_1 = arith.constant 0 : index
    %3 = vector.load %arg8[%c0, %c0_1] : memref<16x32xbf16, #tpu.memory_space<vmem>>, vector<16x32xbf16>
    %c0_2 = arith.constant 0 : index
    %c0_3 = arith.constant 0 : index
    %4 = vector.load %arg5[%c0_2, %c0_3] : memref<32x96xbf16, #tpu.memory_space<vmem>>, vector<32x96xbf16>
    %cst = arith.constant dense<0.000000e+00> : vector<16x96xf32>
    %5 = tpu.matmul %3, %4, %cst {dimension_numbers = #tpu.dot_dimension_numbers<[1], [0], [0], [1], [0, 0, 1, 1], [], []>} : vector<16x32xbf16>, vector<32x96xbf16>, vector<16x96xf32> -> vector<16x96xf32>
    %c0_4 = arith.constant 0 : index
    %c0_5 = arith.constant 0 : index
    %6 = vector.load %arg6[%c0_4, %c0_5] : memref<1x96xf32, #tpu.memory_space<vmem>>, vector<1x96xf32>
    %7 = vector.broadcast %6 : vector<1x96xf32> to vector<16x96xf32>
    %8 = arith.addf %5, %7 : vector<16x96xf32>
    %9 = arith.truncf %8 : vector<16x96xf32> to vector<16x96xbf16>
    %c0_6 = arith.constant 0 : index
    %c0_7 = arith.constant 0 : index
    %10 = vector.load %arg7[%c0_6, %c0_7] : memref<16x96xbf16, #tpu.memory_space<vmem>>, vector<16x96xbf16>
    tpu.vector_store %arg7[%c0_6, %c0_7], %9 {strides = array<i32>} : memref<16x96xbf16, #tpu.memory_space<vmem>>, vector<16x96xbf16>,
    return
  }
  func.func @transform_0(%arg0: i32, %arg1: i32) -> (i32, i32) {
    %c0_i32 = arith.constant 0 : i32
    %c0_i32_0 = arith.constant 0 : i32
    return %arg0, %c0_i32 : i32, i32
  }
  func.func @transform_1(%arg0: i32, %arg1: i32) -> (i32, i32) {
    %c0_i32 = arith.constant 0 : i32
    %c0_i32_0 = arith.constant 0 : i32
    %c0_i32_1 = arith.constant 0 : i32
    return %c0_i32, %c0_i32_0 : i32, i32
  }
  func.func @transform_2(%arg0: i32, %arg1: i32) -> (i32, i32) {
    %c0_i32 = arith.constant 0 : i32
    %c0_i32_0 = arith.constant 0 : i32
    %c0_i32_1 = arith.constant 0 : i32
    return %c0_i32, %c0_i32_0 : i32, i32
  }
  func.func @transform_3(%arg0: i32, %arg1: i32) -> (i32, i32) {
    %c0_i32 = arith.constant 0 : i32
    %c0_i32_0 = arith.constant 0 : i32
    return %c0_i32, %arg1 : i32, i32
  }
  func.func @transform_4(%arg0: i32, %arg1: i32) -> (i32, i32) {
    %c0_i32 = arith.constant 0 : i32
    %c0_i32_0 = arith.constant 0 : i32
    return %c0_i32, %arg1 : i32, i32
  }
  func.func @transform_5(%arg0: i32, %arg1: i32) -> (i32, i32) {
    %c0_i32 = arith.constant 0 : i32
    return %arg0, %arg1 : i32, i32
  }
}

module attributes {stable_mosaic.version = 11 : i64} {
  func.func @linear_residual_kernel(%arg0: i32, %arg1: i32, %arg2: memref<16x32xbf16, #tpu.memory_space<vmem>>, %arg3: memref<32x32xbf16, #tpu.memory_space<vmem>>, %arg4: memref<1x32xf32, #tpu.memory_space<vmem>>, %arg5: memref<16x32xbf16, #tpu.memory_space<vmem>>, %arg6: memref<16x32xbf16, #tpu.memory_space<vmem>>, %arg7: memref<16x32xf32, #tpu.memory_space<vmem>>) attributes {dimension_semantics = [#tpu.dimension_semantics<parallel>, #tpu.dimension_semantics<arbitrary>], iteration_bounds = array<i64: 1, 1>, scalar_prefetch = 0 : i64, scratch_operands = 1 : i64, tpu.core_type = #tpu.core_type<tc>, window_params = [{transform_indices = @transform_0, window_bounds = array<i64: 16, 32>}, {transform_indices = @transform_1, window_bounds = array<i64: 32, 32>}, {pipeline_mode = #tpu.pipeline_mode<synchronous>, transform_indices = @transform_2, window_bounds = array<i64: 1, 32>}, {transform_indices = @transform_3, window_bounds = array<i64: 16, 32>}, {transform_indices = @transform_4, window_bounds = array<i64: 16, 32>}]} {
    %c0_i32 = arith.constant 0 : i32
    %0 = arith.cmpi eq, %arg1, %c0_i32 : i32
    %1 = arith.extui %0 : i1 to i32
    %c0_i32_0 = arith.constant 0 : i32
    %2 = arith.cmpi ne, %1, %c0_i32_0 : i32
    scf.if %2 {
      %c0_10 = arith.constant 0 : index
      %c0_11 = arith.constant 0 : index
      %12 = vector.load %arg5[%c0_10, %c0_11] : memref<16x32xbf16, #tpu.memory_space<vmem>>, vector<16x32xbf16>
      %13 = arith.extf %12 : vector<16x32xbf16> to vector<16x32xf32>
      %c0_12 = arith.constant 0 : index
      %c0_13 = arith.constant 0 : index
      %14 = vector.load %arg4[%c0_12, %c0_13] : memref<1x32xf32, #tpu.memory_space<vmem>>, vector<1x32xf32>
      %15 = vector.broadcast %14 : vector<1x32xf32> to vector<16x32xf32>
      %16 = arith.addf %13, %15 : vector<16x32xf32>
      %c0_14 = arith.constant 0 : index
      %c0_15 = arith.constant 0 : index
      %17 = vector.load %arg7[%c0_14, %c0_15] : memref<16x32xf32, #tpu.memory_space<vmem>>, vector<16x32xf32>
      tpu.vector_store %arg7[%c0_14, %c0_15], %16 {strides = array<i32>} : memref<16x32xf32, #tpu.memory_space<vmem>>, vector<16x32xf32>,
    } else {
    }
    %c0 = arith.constant 0 : index
    %c0_1 = arith.constant 0 : index
    %3 = vector.load %arg7[%c0, %c0_1] : memref<16x32xf32, #tpu.memory_space<vmem>>, vector<16x32xf32>
    %c0_2 = arith.constant 0 : index
    %c0_3 = arith.constant 0 : index
    %4 = vector.load %arg2[%c0_2, %c0_3] : memref<16x32xbf16, #tpu.memory_space<vmem>>, vector<16x32xbf16>
    %c0_4 = arith.constant 0 : index
    %c0_5 = arith.constant 0 : index
    %5 = vector.load %arg3[%c0_4, %c0_5] : memref<32x32xbf16, #tpu.memory_space<vmem>>, vector<32x32xbf16>
    %cst = arith.constant dense<0.000000e+00> : vector<16x32xf32>
    %6 = tpu.matmul %4, %5, %cst {dimension_numbers = #tpu.dot_dimension_numbers<[1], [0], [0], [1], [0, 0, 1, 1], [], []>} : vector<16x32xbf16>, vector<32x32xbf16>, vector<16x32xf32> -> vector<16x32xf32>
    %7 = arith.addf %3, %6 : vector<16x32xf32>
    %c0_6 = arith.constant 0 : index
    %c0_7 = arith.constant 0 : index
    %8 = vector.load %arg7[%c0_6, %c0_7] : memref<16x32xf32, #tpu.memory_space<vmem>>, vector<16x32xf32>
    tpu.vector_store %arg7[%c0_6, %c0_7], %7 {strides = array<i32>} : memref<16x32xf32, #tpu.memory_space<vmem>>, vector<16x32xf32>,
    %c0_i32_8 = arith.constant 0 : i32
    %9 = arith.cmpi eq, %arg1, %c0_i32_8 : i32
    %10 = arith.extui %9 : i1 to i32
    %c0_i32_9 = arith.constant 0 : i32
    %11 = arith.cmpi ne, %10, %c0_i32_9 : i32
    scf.if %11 {
      %c0_10 = arith.constant 0 : index
      %c0_11 = arith.constant 0 : index
      %12 = vector.load %arg7[%c0_10, %c0_11] : memref<16x32xf32, #tpu.memory_space<vmem>>, vector<16x32xf32>
      %13 = arith.truncf %12 : vector<16x32xf32> to vector<16x32xbf16>
      %c0_12 = arith.constant 0 : index
      %c0_13 = arith.constant 0 : index
      %14 = vector.load %arg6[%c0_12, %c0_13] : memref<16x32xbf16, #tpu.memory_space<vmem>>, vector<16x32xbf16>
      tpu.vector_store %arg6[%c0_12, %c0_13], %13 {strides = array<i32>} : memref<16x32xbf16, #tpu.memory_space<vmem>>, vector<16x32xbf16>,
    } else {
    }
    return
  }
  func.func @transform_0(%arg0: i32, %arg1: i32) -> (i32, i32) {
    %c0_i32 = arith.constant 0 : i32
    return %arg0, %arg1 : i32, i32
  }
  func.func @transform_1(%arg0: i32, %arg1: i32) -> (i32, i32) {
    %c0_i32 = arith.constant 0 : i32
    %c0_i32_0 = arith.constant 0 : i32
    return %arg1, %c0_i32 : i32, i32
  }
  func.func @transform_2(%arg0: i32, %arg1: i32) -> (i32, i32) {
    %c0_i32 = arith.constant 0 : i32
    %c0_i32_0 = arith.constant 0 : i32
    %c0_i32_1 = arith.constant 0 : i32
    return %c0_i32, %c0_i32_0 : i32, i32
  }
  func.func @transform_3(%arg0: i32, %arg1: i32) -> (i32, i32) {
    %c0_i32 = arith.constant 0 : i32
    %c0_i32_0 = arith.constant 0 : i32
    return %arg0, %c0_i32 : i32, i32
  }
  func.func @transform_4(%arg0: i32, %arg1: i32) -> (i32, i32) {
    %c0_i32 = arith.constant 0 : i32
    %c0_i32_0 = arith.constant 0 : i32
    return %arg0, %c0_i32 : i32, i32
  }
}

module attributes {stable_mosaic.version = 11 : i64} {
  func.func @flash_attn_kernel(%arg0: i32, %arg1: i32, %arg2: i32, %arg3: memref<1x8x32xbf16, #tpu.memory_space<vmem>>, %arg4: memref<1x8x32xbf16, #tpu.memory_space<vmem>>, %arg5: memref<1x8x32xbf16, #tpu.memory_space<vmem>>, %arg6: memref<1x8x32xbf16, #tpu.memory_space<vmem>>, %arg7: memref<8x4xf32, #tpu.memory_space<vmem>>, %arg8: memref<8x4xf32, #tpu.memory_space<vmem>>, %arg9: memref<8x32xf32, #tpu.memory_space<vmem>>) attributes {dimension_semantics = [#tpu.dimension_semantics<parallel>, #tpu.dimension_semantics<parallel>, #tpu.dimension_semantics<arbitrary>], iteration_bounds = array<i64: 2, 1, 1>, scalar_prefetch = 0 : i64, scratch_operands = 3 : i64, tpu.core_type = #tpu.core_type<tc>, window_params = [{transform_indices = @transform_0, window_bounds = array<i64: 1, 8, 32>}, {transform_indices = @transform_1, window_bounds = array<i64: 1, 8, 32>}, {transform_indices = @transform_2, window_bounds = array<i64: 1, 8, 32>}, {transform_indices = @transform_3, window_bounds = array<i64: 1, 8, 32>}]} {
    %c0_i32 = arith.constant 0 : i32
    %0 = arith.cmpi eq, %arg2, %c0_i32 : i32
    %1 = arith.extui %0 : i1 to i32
    %c0_i32_0 = arith.constant 0 : i32
    %2 = arith.cmpi ne, %1, %c0_i32_0 : i32
    scf.if %2 {
      %cst = arith.constant -1.000000e+30 : f32
      %12 = vector.broadcast %cst : f32 to vector<8x4xf32>
      %c0 = arith.constant 0 : index
      %c0_5 = arith.constant 0 : index
      %13 = vector.load %arg7[%c0, %c0_5] : memref<8x4xf32, #tpu.memory_space<vmem>>, vector<8x4xf32>
      tpu.vector_store %arg7[%c0, %c0_5], %12 {strides = array<i32>} : memref<8x4xf32, #tpu.memory_space<vmem>>, vector<8x4xf32>,
      %cst_6 = arith.constant 0.000000e+00 : f32
      %14 = vector.broadcast %cst_6 : f32 to vector<8x4xf32>
      %c0_7 = arith.constant 0 : index
      %c0_8 = arith.constant 0 : index
      %15 = vector.load %arg8[%c0_7, %c0_8] : memref<8x4xf32, #tpu.memory_space<vmem>>, vector<8x4xf32>
      tpu.vector_store %arg8[%c0_7, %c0_8], %14 {strides = array<i32>} : memref<8x4xf32, #tpu.memory_space<vmem>>, vector<8x4xf32>,
      %cst_9 = arith.constant 0.000000e+00 : f32
      %16 = vector.broadcast %cst_9 : f32 to vector<8x32xf32>
      %c0_10 = arith.constant 0 : index
      %c0_11 = arith.constant 0 : index
      %17 = vector.load %arg9[%c0_10, %c0_11] : memref<8x32xf32, #tpu.memory_space<vmem>>, vector<8x32xf32>
      tpu.vector_store %arg9[%c0_10, %c0_11], %16 {strides = array<i32>} : memref<8x32xf32, #tpu.memory_space<vmem>>, vector<8x32xf32>,
    } else {
    }
    %c8_i32 = arith.constant 8 : i32
    %3 = arith.muli %arg2, %c8_i32 : i32
    %c1_i32 = arith.constant 1 : i32
    %4 = arith.addi %arg1, %c1_i32 : i32
    %c8_i32_1 = arith.constant 8 : i32
    %5 = arith.muli %4, %c8_i32_1 : i32
    %6 = arith.cmpi slt, %3, %5 : i32
    %7 = arith.extui %6 : i1 to i32
    %c0_i32_2 = arith.constant 0 : i32
    %8 = arith.cmpi ne, %7, %c0_i32_2 : i32
    scf.if %8 {
      %c8_i32_5 = arith.constant 8 : i32
      %12 = arith.muli %arg1, %c8_i32_5 : i32
      %13 = tpu.iota {dimensions = array<i32: 0>} : vector<8x8xi32>
      %14 = vector.broadcast %12 : i32 to vector<8x8xi32>
      %15 = arith.addi %14, %13 : vector<8x8xi32>
      %c8_i32_6 = arith.constant 8 : i32
      %16 = arith.muli %arg2, %c8_i32_6 : i32
      %17 = tpu.iota {dimensions = array<i32: 1>} : vector<8x8xi32>
      %18 = vector.broadcast %16 : i32 to vector<8x8xi32>
      %19 = arith.addi %18, %17 : vector<8x8xi32>
      %20 = arith.cmpi sle, %19, %15 : vector<8x8xi32>
      %c0 = arith.constant 0 : index
      %c0_7 = arith.constant 0 : index
      %c0_8 = arith.constant 0 : index
      %21 = vector.load %arg3[%c0, %c0_7, %c0_8] : memref<1x8x32xbf16, #tpu.memory_space<vmem>>, vector<1x8x8xbf16>
      %22 = vector.shape_cast %21 : vector<1x8x8xbf16> to vector<8x8xbf16>
      %c0_9 = arith.constant 0 : index
      %c0_10 = arith.constant 0 : index
      %c0_11 = arith.constant 0 : index
      %23 = vector.load %arg4[%c0_9, %c0_10, %c0_11] : memref<1x8x32xbf16, #tpu.memory_space<vmem>>, vector<1x8x8xbf16>
      %24 = vector.shape_cast %23 : vector<1x8x8xbf16> to vector<8x8xbf16>
      %c0_12 = arith.constant 0 : index
      %c0_13 = arith.constant 0 : index
      %c0_14 = arith.constant 0 : index
      %25 = vector.load %arg5[%c0_12, %c0_13, %c0_14] : memref<1x8x32xbf16, #tpu.memory_space<vmem>>, vector<1x8x8xbf16>
      %26 = vector.shape_cast %25 : vector<1x8x8xbf16> to vector<8x8xbf16>
      %cst = arith.constant dense<0.000000e+00> : vector<8x8xf32>
      %27 = tpu.matmul %22, %24, %cst {dimension_numbers = #tpu.dot_dimension_numbers<[1], [1], [0], [0], [0, 0, 1, 0], [], []>} : vector<8x8xbf16>, vector<8x8xbf16>, vector<8x8xf32> -> vector<8x8xf32>
      %cst_15 = arith.constant 0.353553385 : f32
      %28 = vector.broadcast %cst_15 : f32 to vector<8x8xf32>
      %29 = arith.mulf %27, %28 : vector<8x8xf32>
      %cst_16 = arith.constant -1.000000e+30 : f32
      %30 = vector.broadcast %cst_16 : f32 to vector<8x8xf32>
      %31 = arith.select %20, %29, %30 : vector<8x8xi1>, vector<8x8xf32>
      %c0_17 = arith.constant 0 : index
      %c0_18 = arith.constant 0 : index
      %32 = vector.load %arg7[%c0_17, %c0_18] : memref<8x4xf32, #tpu.memory_space<vmem>>, vector<8x1xf32>
      %c0_19 = arith.constant 0 : index
      %c0_20 = arith.constant 0 : index
      %33 = vector.load %arg8[%c0_19, %c0_20] : memref<8x4xf32, #tpu.memory_space<vmem>>, vector<8x1xf32>
      %cst_21 = arith.constant dense<0xFF800000> : vector<8xf32>
      %34 = vector.multi_reduction <maximumf>, %31, %cst_21 [1] : vector<8x8xf32> to vector<8xf32>
      %35 = vector.shape_cast %34 : vector<8xf32> to vector<8x1xf32>
      %36 = arith.maximumf %32, %35 : vector<8x1xf32>
      %37 = arith.subf %32, %36 : vector<8x1xf32>
      %38 = math.exp %37 : vector<8x1xf32>
      %39 = vector.broadcast %36 : vector<8x1xf32> to vector<8x8xf32>
      %40 = arith.subf %31, %39 : vector<8x8xf32>
      %41 = math.exp %40 : vector<8x8xf32>
      %42 = arith.mulf %38, %33 : vector<8x1xf32>
      %cst_22 = arith.constant dense<0.000000e+00> : vector<8xf32>
      %43 = vector.multi_reduction <add>, %41, %cst_22 [1] : vector<8x8xf32> to vector<8xf32>
      %44 = vector.shape_cast %43 : vector<8xf32> to vector<8x1xf32>
      %45 = arith.addf %42, %44 : vector<8x1xf32>
      %c0_23 = arith.constant 0 : index
      %c0_24 = arith.constant 0 : index
      %46 = vector.load %arg8[%c0_23, %c0_24] : memref<8x4xf32, #tpu.memory_space<vmem>>, vector<8x1xf32>
      tpu.vector_store %arg8[%c0_23, %c0_24], %45 {strides = array<i32>} : memref<8x4xf32, #tpu.memory_space<vmem>>, vector<8x1xf32>,
      %c0_25 = arith.constant 0 : index
      %c0_26 = arith.constant 0 : index
      %47 = vector.load %arg9[%c0_25, %c0_26] : memref<8x32xf32, #tpu.memory_space<vmem>>, vector<8x8xf32>
      %48 = vector.broadcast %38 : vector<8x1xf32> to vector<8x8xf32>
      %49 = arith.mulf %48, %47 : vector<8x8xf32>
      %50 = arith.truncf %41 : vector<8x8xf32> to vector<8x8xbf16>
      %cst_27 = arith.constant dense<0.000000e+00> : vector<8x8xf32>
      %51 = tpu.matmul %50, %26, %cst_27 {dimension_numbers = #tpu.dot_dimension_numbers<[1], [0], [0], [1], [0, 0, 1, 1], [], []>} : vector<8x8xbf16>, vector<8x8xbf16>, vector<8x8xf32> -> vector<8x8xf32>
      %52 = arith.addf %49, %51 : vector<8x8xf32>
      %c0_28 = arith.constant 0 : index
      %c0_29 = arith.constant 0 : index
      %53 = vector.load %arg9[%c0_28, %c0_29] : memref<8x32xf32, #tpu.memory_space<vmem>>, vector<8x8xf32>
      tpu.vector_store %arg9[%c0_28, %c0_29], %52 {strides = array<i32>} : memref<8x32xf32, #tpu.memory_space<vmem>>, vector<8x8xf32>,
      %c0_30 = arith.constant 0 : index
      %c0_31 = arith.constant 0 : index
      %54 = vector.load %arg7[%c0_30, %c0_31] : memref<8x4xf32, #tpu.memory_space<vmem>>, vector<8x1xf32>
      tpu.vector_store %arg7[%c0_30, %c0_31], %36 {strides = array<i32>} : memref<8x4xf32, #tpu.memory_space<vmem>>, vector<8x1xf32>,
      %c0_32 = arith.constant 0 : index
      %c0_33 = arith.constant 0 : index
      %c8 = arith.constant 8 : index
      %55 = vector.load %arg3[%c0_32, %c0_33, %c8] : memref<1x8x32xbf16, #tpu.memory_space<vmem>>, vector<1x8x8xbf16>
      %56 = vector.shape_cast %55 : vector<1x8x8xbf16> to vector<8x8xbf16>
      %c0_34 = arith.constant 0 : index
      %c0_35 = arith.constant 0 : index
      %c8_36 = arith.constant 8 : index
      %57 = vector.load %arg4[%c0_34, %c0_35, %c8_36] : memref<1x8x32xbf16, #tpu.memory_space<vmem>>, vector<1x8x8xbf16>
      %58 = vector.shape_cast %57 : vector<1x8x8xbf16> to vector<8x8xbf16>
      %c0_37 = arith.constant 0 : index
      %c0_38 = arith.constant 0 : index
      %c8_39 = arith.constant 8 : index
      %59 = vector.load %arg5[%c0_37, %c0_38, %c8_39] : memref<1x8x32xbf16, #tpu.memory_space<vmem>>, vector<1x8x8xbf16>
      %60 = vector.shape_cast %59 : vector<1x8x8xbf16> to vector<8x8xbf16>
      %cst_40 = arith.constant dense<0.000000e+00> : vector<8x8xf32>
      %61 = tpu.matmul %56, %58, %cst_40 {dimension_numbers = #tpu.dot_dimension_numbers<[1], [1], [0], [0], [0, 0, 1, 0], [], []>} : vector<8x8xbf16>, vector<8x8xbf16>, vector<8x8xf32> -> vector<8x8xf32>
      %cst_41 = arith.constant 0.353553385 : f32
      %62 = vector.broadcast %cst_41 : f32 to vector<8x8xf32>
      %63 = arith.mulf %61, %62 : vector<8x8xf32>
      %cst_42 = arith.constant -1.000000e+30 : f32
      %64 = vector.broadcast %cst_42 : f32 to vector<8x8xf32>
      %65 = arith.select %20, %63, %64 : vector<8x8xi1>, vector<8x8xf32>
      %c0_43 = arith.constant 0 : index
      %c1 = arith.constant 1 : index
      %66 = vector.load %arg7[%c0_43, %c1] : memref<8x4xf32, #tpu.memory_space<vmem>>, vector<8x1xf32>
      %c0_44 = arith.constant 0 : index
      %c1_45 = arith.constant 1 : index
      %67 = vector.load %arg8[%c0_44, %c1_45] : memref<8x4xf32, #tpu.memory_space<vmem>>, vector<8x1xf32>
      %cst_46 = arith.constant dense<0xFF800000> : vector<8xf32>
      %68 = vector.multi_reduction <maximumf>, %65, %cst_46 [1] : vector<8x8xf32> to vector<8xf32>
      %69 = vector.shape_cast %68 : vector<8xf32> to vector<8x1xf32>
      %70 = arith.maximumf %66, %69 : vector<8x1xf32>
      %71 = arith.subf %66, %70 : vector<8x1xf32>
      %72 = math.exp %71 : vector<8x1xf32>
      %73 = vector.broadcast %70 : vector<8x1xf32> to vector<8x8xf32>
      %74 = arith.subf %65, %73 : vector<8x8xf32>
      %75 = math.exp %74 : vector<8x8xf32>
      %76 = arith.mulf %72, %67 : vector<8x1xf32>
      %cst_47 = arith.constant dense<0.000000e+00> : vector<8xf32>
      %77 = vector.multi_reduction <add>, %75, %cst_47 [1] : vector<8x8xf32> to vector<8xf32>
      %78 = vector.shape_cast %77 : vector<8xf32> to vector<8x1xf32>
      %79 = arith.addf %76, %78 : vector<8x1xf32>
      %c0_48 = arith.constant 0 : index
      %c1_49 = arith.constant 1 : index
      %80 = vector.load %arg8[%c0_48, %c1_49] : memref<8x4xf32, #tpu.memory_space<vmem>>, vector<8x1xf32>
      tpu.vector_store %arg8[%c0_48, %c1_49], %79 {strides = array<i32>} : memref<8x4xf32, #tpu.memory_space<vmem>>, vector<8x1xf32>,
      %c0_50 = arith.constant 0 : index
      %c8_51 = arith.constant 8 : index
      %81 = vector.load %arg9[%c0_50, %c8_51] : memref<8x32xf32, #tpu.memory_space<vmem>>, vector<8x8xf32>
      %82 = vector.broadcast %72 : vector<8x1xf32> to vector<8x8xf32>
      %83 = arith.mulf %82, %81 : vector<8x8xf32>
      %84 = arith.truncf %75 : vector<8x8xf32> to vector<8x8xbf16>
      %cst_52 = arith.constant dense<0.000000e+00> : vector<8x8xf32>
      %85 = tpu.matmul %84, %60, %cst_52 {dimension_numbers = #tpu.dot_dimension_numbers<[1], [0], [0], [1], [0, 0, 1, 1], [], []>} : vector<8x8xbf16>, vector<8x8xbf16>, vector<8x8xf32> -> vector<8x8xf32>
      %86 = arith.addf %83, %85 : vector<8x8xf32>
      %c0_53 = arith.constant 0 : index
      %c8_54 = arith.constant 8 : index
      %87 = vector.load %arg9[%c0_53, %c8_54] : memref<8x32xf32, #tpu.memory_space<vmem>>, vector<8x8xf32>
      tpu.vector_store %arg9[%c0_53, %c8_54], %86 {strides = array<i32>} : memref<8x32xf32, #tpu.memory_space<vmem>>, vector<8x8xf32>,
      %c0_55 = arith.constant 0 : index
      %c1_56 = arith.constant 1 : index
      %88 = vector.load %arg7[%c0_55, %c1_56] : memref<8x4xf32, #tpu.memory_space<vmem>>, vector<8x1xf32>
      tpu.vector_store %arg7[%c0_55, %c1_56], %70 {strides = array<i32>} : memref<8x4xf32, #tpu.memory_space<vmem>>, vector<8x1xf32>,
      %c0_57 = arith.constant 0 : index
      %c0_58 = arith.constant 0 : index
      %c16 = arith.constant 16 : index
      %89 = vector.load %arg3[%c0_57, %c0_58, %c16] : memref<1x8x32xbf16, #tpu.memory_space<vmem>>, vector<1x8x8xbf16>
      %90 = vector.shape_cast %89 : vector<1x8x8xbf16> to vector<8x8xbf16>
      %c0_59 = arith.constant 0 : index
      %c0_60 = arith.constant 0 : index
      %c16_61 = arith.constant 16 : index
      %91 = vector.load %arg4[%c0_59, %c0_60, %c16_61] : memref<1x8x32xbf16, #tpu.memory_space<vmem>>, vector<1x8x8xbf16>
      %92 = vector.shape_cast %91 : vector<1x8x8xbf16> to vector<8x8xbf16>
      %c0_62 = arith.constant 0 : index
      %c0_63 = arith.constant 0 : index
      %c16_64 = arith.constant 16 : index
      %93 = vector.load %arg5[%c0_62, %c0_63, %c16_64] : memref<1x8x32xbf16, #tpu.memory_space<vmem>>, vector<1x8x8xbf16>
      %94 = vector.shape_cast %93 : vector<1x8x8xbf16> to vector<8x8xbf16>
      %cst_65 = arith.constant dense<0.000000e+00> : vector<8x8xf32>
      %95 = tpu.matmul %90, %92, %cst_65 {dimension_numbers = #tpu.dot_dimension_numbers<[1], [1], [0], [0], [0, 0, 1, 0], [], []>} : vector<8x8xbf16>, vector<8x8xbf16>, vector<8x8xf32> -> vector<8x8xf32>
      %cst_66 = arith.constant 0.353553385 : f32
      %96 = vector.broadcast %cst_66 : f32 to vector<8x8xf32>
      %97 = arith.mulf %95, %96 : vector<8x8xf32>
      %cst_67 = arith.constant -1.000000e+30 : f32
      %98 = vector.broadcast %cst_67 : f32 to vector<8x8xf32>
      %99 = arith.select %20, %97, %98 : vector<8x8xi1>, vector<8x8xf32>
      %c0_68 = arith.constant 0 : index
      %c2 = arith.constant 2 : index
      %100 = vector.load %arg7[%c0_68, %c2] : memref<8x4xf32, #tpu.memory_space<vmem>>, vector<8x1xf32>
      %c0_69 = arith.constant 0 : index
      %c2_70 = arith.constant 2 : index
      %101 = vector.load %arg8[%c0_69, %c2_70] : memref<8x4xf32, #tpu.memory_space<vmem>>, vector<8x1xf32>
      %cst_71 = arith.constant dense<0xFF800000> : vector<8xf32>
      %102 = vector.multi_reduction <maximumf>, %99, %cst_71 [1] : vector<8x8xf32> to vector<8xf32>
      %103 = vector.shape_cast %102 : vector<8xf32> to vector<8x1xf32>
      %104 = arith.maximumf %100, %103 : vector<8x1xf32>
      %105 = arith.subf %100, %104 : vector<8x1xf32>
      %106 = math.exp %105 : vector<8x1xf32>
      %107 = vector.broadcast %104 : vector<8x1xf32> to vector<8x8xf32>
      %108 = arith.subf %99, %107 : vector<8x8xf32>
      %109 = math.exp %108 : vector<8x8xf32>
      %110 = arith.mulf %106, %101 : vector<8x1xf32>
      %cst_72 = arith.constant dense<0.000000e+00> : vector<8xf32>
      %111 = vector.multi_reduction <add>, %109, %cst_72 [1] : vector<8x8xf32> to vector<8xf32>
      %112 = vector.shape_cast %111 : vector<8xf32> to vector<8x1xf32>
      %113 = arith.addf %110, %112 : vector<8x1xf32>
      %c0_73 = arith.constant 0 : index
      %c2_74 = arith.constant 2 : index
      %114 = vector.load %arg8[%c0_73, %c2_74] : memref<8x4xf32, #tpu.memory_space<vmem>>, vector<8x1xf32>
      tpu.vector_store %arg8[%c0_73, %c2_74], %113 {strides = array<i32>} : memref<8x4xf32, #tpu.memory_space<vmem>>, vector<8x1xf32>,
      %c0_75 = arith.constant 0 : index
      %c16_76 = arith.constant 16 : index
      %115 = vector.load %arg9[%c0_75, %c16_76] : memref<8x32xf32, #tpu.memory_space<vmem>>, vector<8x8xf32>
      %116 = vector.broadcast %106 : vector<8x1xf32> to vector<8x8xf32>
      %117 = arith.mulf %116, %115 : vector<8x8xf32>
      %118 = arith.truncf %109 : vector<8x8xf32> to vector<8x8xbf16>
      %cst_77 = arith.constant dense<0.000000e+00> : vector<8x8xf32>
      %119 = tpu.matmul %118, %94, %cst_77 {dimension_numbers = #tpu.dot_dimension_numbers<[1], [0], [0], [1], [0, 0, 1, 1], [], []>} : vector<8x8xbf16>, vector<8x8xbf16>, vector<8x8xf32> -> vector<8x8xf32>
      %120 = arith.addf %117, %119 : vector<8x8xf32>
      %c0_78 = arith.constant 0 : index
      %c16_79 = arith.constant 16 : index
      %121 = vector.load %arg9[%c0_78, %c16_79] : memref<8x32xf32, #tpu.memory_space<vmem>>, vector<8x8xf32>
      tpu.vector_store %arg9[%c0_78, %c16_79], %120 {strides = array<i32>} : memref<8x32xf32, #tpu.memory_space<vmem>>, vector<8x8xf32>,
      %c0_80 = arith.constant 0 : index
      %c2_81 = arith.constant 2 : index
      %122 = vector.load %arg7[%c0_80, %c2_81] : memref<8x4xf32, #tpu.memory_space<vmem>>, vector<8x1xf32>
      tpu.vector_store %arg7[%c0_80, %c2_81], %104 {strides = array<i32>} : memref<8x4xf32, #tpu.memory_space<vmem>>, vector<8x1xf32>,
      %c0_82 = arith.constant 0 : index
      %c0_83 = arith.constant 0 : index
      %c24 = arith.constant 24 : index
      %123 = vector.load %arg3[%c0_82, %c0_83, %c24] : memref<1x8x32xbf16, #tpu.memory_space<vmem>>, vector<1x8x8xbf16>
      %124 = vector.shape_cast %123 : vector<1x8x8xbf16> to vector<8x8xbf16>
      %c0_84 = arith.constant 0 : index
      %c0_85 = arith.constant 0 : index
      %c24_86 = arith.constant 24 : index
      %125 = vector.load %arg4[%c0_84, %c0_85, %c24_86] : memref<1x8x32xbf16, #tpu.memory_space<vmem>>, vector<1x8x8xbf16>
      %126 = vector.shape_cast %125 : vector<1x8x8xbf16> to vector<8x8xbf16>
      %c0_87 = arith.constant 0 : index
      %c0_88 = arith.constant 0 : index
      %c24_89 = arith.constant 24 : index
      %127 = vector.load %arg5[%c0_87, %c0_88, %c24_89] : memref<1x8x32xbf16, #tpu.memory_space<vmem>>, vector<1x8x8xbf16>
      %128 = vector.shape_cast %127 : vector<1x8x8xbf16> to vector<8x8xbf16>
      %cst_90 = arith.constant dense<0.000000e+00> : vector<8x8xf32>
      %129 = tpu.matmul %124, %126, %cst_90 {dimension_numbers = #tpu.dot_dimension_numbers<[1], [1], [0], [0], [0, 0, 1, 0], [], []>} : vector<8x8xbf16>, vector<8x8xbf16>, vector<8x8xf32> -> vector<8x8xf32>
      %cst_91 = arith.constant 0.353553385 : f32
      %130 = vector.broadcast %cst_91 : f32 to vector<8x8xf32>
      %131 = arith.mulf %129, %130 : vector<8x8xf32>
      %cst_92 = arith.constant -1.000000e+30 : f32
      %132 = vector.broadcast %cst_92 : f32 to vector<8x8xf32>
      %133 = arith.select %20, %131, %132 : vector<8x8xi1>, vector<8x8xf32>
      %c0_93 = arith.constant 0 : index
      %c3 = arith.constant 3 : index
      %134 = vector.load %arg7[%c0_93, %c3] : memref<8x4xf32, #tpu.memory_space<vmem>>, vector<8x1xf32>
      %c0_94 = arith.constant 0 : index
      %c3_95 = arith.constant 3 : index
      %135 = vector.load %arg8[%c0_94, %c3_95] : memref<8x4xf32, #tpu.memory_space<vmem>>, vector<8x1xf32>
      %cst_96 = arith.constant dense<0xFF800000> : vector<8xf32>
      %136 = vector.multi_reduction <maximumf>, %133, %cst_96 [1] : vector<8x8xf32> to vector<8xf32>
      %137 = vector.shape_cast %136 : vector<8xf32> to vector<8x1xf32>
      %138 = arith.maximumf %134, %137 : vector<8x1xf32>
      %139 = arith.subf %134, %138 : vector<8x1xf32>
      %140 = math.exp %139 : vector<8x1xf32>
      %141 = vector.broadcast %138 : vector<8x1xf32> to vector<8x8xf32>
      %142 = arith.subf %133, %141 : vector<8x8xf32>
      %143 = math.exp %142 : vector<8x8xf32>
      %144 = arith.mulf %140, %135 : vector<8x1xf32>
      %cst_97 = arith.constant dense<0.000000e+00> : vector<8xf32>
      %145 = vector.multi_reduction <add>, %143, %cst_97 [1] : vector<8x8xf32> to vector<8xf32>
      %146 = vector.shape_cast %145 : vector<8xf32> to vector<8x1xf32>
      %147 = arith.addf %144, %146 : vector<8x1xf32>
      %c0_98 = arith.constant 0 : index
      %c3_99 = arith.constant 3 : index
      %148 = vector.load %arg8[%c0_98, %c3_99] : memref<8x4xf32, #tpu.memory_space<vmem>>, vector<8x1xf32>
      tpu.vector_store %arg8[%c0_98, %c3_99], %147 {strides = array<i32>} : memref<8x4xf32, #tpu.memory_space<vmem>>, vector<8x1xf32>,
      %c0_100 = arith.constant 0 : index
      %c24_101 = arith.constant 24 : index
      %149 = vector.load %arg9[%c0_100, %c24_101] : memref<8x32xf32, #tpu.memory_space<vmem>>, vector<8x8xf32>
      %150 = vector.broadcast %140 : vector<8x1xf32> to vector<8x8xf32>
      %151 = arith.mulf %150, %149 : vector<8x8xf32>
      %152 = arith.truncf %143 : vector<8x8xf32> to vector<8x8xbf16>
      %cst_102 = arith.constant dense<0.000000e+00> : vector<8x8xf32>
      %153 = tpu.matmul %152, %128, %cst_102 {dimension_numbers = #tpu.dot_dimension_numbers<[1], [0], [0], [1], [0, 0, 1, 1], [], []>} : vector<8x8xbf16>, vector<8x8xbf16>, vector<8x8xf32> -> vector<8x8xf32>
      %154 = arith.addf %151, %153 : vector<8x8xf32>
      %c0_103 = arith.constant 0 : index
      %c24_104 = arith.constant 24 : index
      %155 = vector.load %arg9[%c0_103, %c24_104] : memref<8x32xf32, #tpu.memory_space<vmem>>, vector<8x8xf32>
      tpu.vector_store %arg9[%c0_103, %c24_104], %154 {strides = array<i32>} : memref<8x32xf32, #tpu.memory_space<vmem>>, vector<8x8xf32>,
      %c0_105 = arith.constant 0 : index
      %c3_106 = arith.constant 3 : index
      %156 = vector.load %arg7[%c0_105, %c3_106] : memref<8x4xf32, #tpu.memory_space<vmem>>, vector<8x1xf32>
      tpu.vector_store %arg7[%c0_105, %c3_106], %138 {strides = array<i32>} : memref<8x4xf32, #tpu.memory_space<vmem>>, vector<8x1xf32>,
    } else {
    }
    %c0_i32_3 = arith.constant 0 : i32
    %9 = arith.cmpi eq, %arg2, %c0_i32_3 : i32
    %10 = arith.extui %9 : i1 to i32
    %c0_i32_4 = arith.constant 0 : i32
    %11 = arith.cmpi ne, %10, %c0_i32_4 : i32
    scf.if %11 {
      %c0 = arith.constant 0 : index
      %c0_5 = arith.constant 0 : index
      %12 = vector.load %arg9[%c0, %c0_5] : memref<8x32xf32, #tpu.memory_space<vmem>>, vector<8x8xf32>
      %c0_6 = arith.constant 0 : index
      %c0_7 = arith.constant 0 : index
      %13 = vector.load %arg8[%c0_6, %c0_7] : memref<8x4xf32, #tpu.memory_space<vmem>>, vector<8x1xf32>
      %14 = vector.broadcast %13 : vector<8x1xf32> to vector<8x8xf32>
      %15 = arith.divf %12, %14 : vector<8x8xf32>
      %16 = arith.truncf %15 : vector<8x8xf32> to vector<8x8xbf16>
      %c0_8 = arith.constant 0 : index
      %c0_9 = arith.constant 0 : index
      %c0_10 = arith.constant 0 : index
      %17 = vector.load %arg6[%c0_8, %c0_9, %c0_10] : memref<1x8x32xbf16, #tpu.memory_space<vmem>>, vector<1x8x8xbf16>
      %18 = vector.shape_cast %17 : vector<1x8x8xbf16> to vector<8x8xbf16>
      %19 = vector.shape_cast %16 : vector<8x8xbf16> to vector<1x8x8xbf16>
      tpu.vector_store %arg6[%c0_8, %c0_9, %c0_10], %19 {strides = array<i32>} : memref<1x8x32xbf16, #tpu.memory_space<vmem>>, vector<1x8x8xbf16>,
      %c0_11 = arith.constant 0 : index
      %c8 = arith.constant 8 : index
      %20 = vector.load %arg9[%c0_11, %c8] : memref<8x32xf32, #tpu.memory_space<vmem>>, vector<8x8xf32>
      %c0_12 = arith.constant 0 : index
      %c1 = arith.constant 1 : index
      %21 = vector.load %arg8[%c0_12, %c1] : memref<8x4xf32, #tpu.memory_space<vmem>>, vector<8x1xf32>
      %22 = vector.broadcast %21 : vector<8x1xf32> to vector<8x8xf32>
      %23 = arith.divf %20, %22 : vector<8x8xf32>
      %24 = arith.truncf %23 : vector<8x8xf32> to vector<8x8xbf16>
      %c0_13 = arith.constant 0 : index
      %c0_14 = arith.constant 0 : index
      %c8_15 = arith.constant 8 : index
      %25 = vector.load %arg6[%c0_13, %c0_14, %c8_15] : memref<1x8x32xbf16, #tpu.memory_space<vmem>>, vector<1x8x8xbf16>
      %26 = vector.shape_cast %25 : vector<1x8x8xbf16> to vector<8x8xbf16>
      %27 = vector.shape_cast %24 : vector<8x8xbf16> to vector<1x8x8xbf16>
      tpu.vector_store %arg6[%c0_13, %c0_14, %c8_15], %27 {strides = array<i32>} : memref<1x8x32xbf16, #tpu.memory_space<vmem>>, vector<1x8x8xbf16>,
      %c0_16 = arith.constant 0 : index
      %c16 = arith.constant 16 : index
      %28 = vector.load %arg9[%c0_16, %c16] : memref<8x32xf32, #tpu.memory_space<vmem>>, vector<8x8xf32>
      %c0_17 = arith.constant 0 : index
      %c2 = arith.constant 2 : index
      %29 = vector.load %arg8[%c0_17, %c2] : memref<8x4xf32, #tpu.memory_space<vmem>>, vector<8x1xf32>
      %30 = vector.broadcast %29 : vector<8x1xf32> to vector<8x8xf32>
      %31 = arith.divf %28, %30 : vector<8x8xf32>
      %32 = arith.truncf %31 : vector<8x8xf32> to vector<8x8xbf16>
      %c0_18 = arith.constant 0 : index
      %c0_19 = arith.constant 0 : index
      %c16_20 = arith.constant 16 : index
      %33 = vector.load %arg6[%c0_18, %c0_19, %c16_20] : memref<1x8x32xbf16, #tpu.memory_space<vmem>>, vector<1x8x8xbf16>
      %34 = vector.shape_cast %33 : vector<1x8x8xbf16> to vector<8x8xbf16>
      %35 = vector.shape_cast %32 : vector<8x8xbf16> to vector<1x8x8xbf16>
      tpu.vector_store %arg6[%c0_18, %c0_19, %c16_20], %35 {strides = array<i32>} : memref<1x8x32xbf16, #tpu.memory_space<vmem>>, vector<1x8x8xbf16>,
      %c0_21 = arith.constant 0 : index
      %c24 = arith.constant 24 : index
      %36 = vector.load %arg9[%c0_21, %c24] : memref<8x32xf32, #tpu.memory_space<vmem>>, vector<8x8xf32>
      %c0_22 = arith.constant 0 : index
      %c3 = arith.constant 3 : index
      %37 = vector.load %arg8[%c0_22, %c3] : memref<8x4xf32, #tpu.memory_space<vmem>>, vector<8x1xf32>
      %38 = vector.broadcast %37 : vector<8x1xf32> to vector<8x8xf32>
      %39 = arith.divf %36, %38 : vector<8x8xf32>
      %40 = arith.truncf %39 : vector<8x8xf32> to vector<8x8xbf16>
      %c0_23 = arith.constant 0 : index
      %c0_24 = arith.constant 0 : index
      %c24_25 = arith.constant 24 : index
      %41 = vector.load %arg6[%c0_23, %c0_24, %c24_25] : memref<1x8x32xbf16, #tpu.memory_space<vmem>>, vector<1x8x8xbf16>
      %42 = vector.shape_cast %41 : vector<1x8x8xbf16> to vector<8x8xbf16>
      %43 = vector.shape_cast %40 : vector<8x8xbf16> to vector<1x8x8xbf16>
      tpu.vector_store %arg6[%c0_23, %c0_24, %c24_25], %43 {strides = array<i32>} : memref<1x8x32xbf16, #tpu.memory_space<vmem>>, vector<1x8x8xbf16>,
    } else {
    }
    return
  }
  func.func @transform_0(%arg0: i32, %arg1: i32, %arg2: i32) -> (i32, i32, i32) {
    %c0_i32 = arith.constant 0 : i32
    %c0_i32_0 = arith.constant 0 : i32
    return %arg0, %arg1, %c0_i32 : i32, i32, i32
  }
  func.func @transform_1(%arg0: i32, %arg1: i32, %arg2: i32) -> (i32, i32, i32) {
    %c0_i32 = arith.constant 0 : i32
    %c0_i32_0 = arith.constant 0 : i32
    return %arg0, %arg2, %c0_i32 : i32, i32, i32
  }
  func.func @transform_2(%arg0: i32, %arg1: i32, %arg2: i32) -> (i32, i32, i32) {
    %c0_i32 = arith.constant 0 : i32
    %c0_i32_0 = arith.constant 0 : i32
    return %arg0, %arg2, %c0_i32 : i32, i32, i32
  }
  func.func @transform_3(%arg0: i32, %arg1: i32, %arg2: i32) -> (i32, i32, i32) {
    %c0_i32 = arith.constant 0 : i32
    %c0_i32_0 = arith.constant 0 : i32
    return %arg0, %arg1, %c0_i32 : i32, i32, i32
  }
}

module attributes {stable_mosaic.version = 11 : i64} {
  func.func @ln_linear_kernel(%arg0: i32, %arg1: i32, %arg2: memref<16x32xbf16, #tpu.memory_space<vmem>>, %arg3: memref<1x32xf32, #tpu.memory_space<vmem>>, %arg4: memref<1x32xf32, #tpu.memory_space<vmem>>, %arg5: memref<32x128xbf16, #tpu.memory_space<vmem>>, %arg6: memref<1x128xf32, #tpu.memory_space<vmem>>, %arg7: memref<16x128xbf16, #tpu.memory_space<vmem>>, %arg8: memref<16x32xbf16, #tpu.memory_space<vmem>>) attributes {dimension_semantics = [#tpu.dimension_semantics<parallel>, #tpu.dimension_semantics<arbitrary>], iteration_bounds = array<i64: 1, 1>, scalar_prefetch = 0 : i64, scratch_operands = 1 : i64, tpu.core_type = #tpu.core_type<tc>, window_params = [{transform_indices = @transform_0, window_bounds = array<i64: 16, 32>}, {pipeline_mode = #tpu.pipeline_mode<synchronous>, transform_indices = @transform_1, window_bounds = array<i64: 1, 32>}, {pipeline_mode = #tpu.pipeline_mode<synchronous>, transform_indices = @transform_2, window_bounds = array<i64: 1, 32>}, {transform_indices = @transform_3, window_bounds = array<i64: 32, 128>}, {transform_indices = @transform_4, window_bounds = array<i64: 1, 128>}, {transform_indices = @transform_5, window_bounds = array<i64: 16, 128>}]} {
    %c0_i32 = arith.constant 0 : i32
    %0 = arith.cmpi eq, %arg1, %c0_i32 : i32
    %1 = arith.extui %0 : i1 to i32
    %c0_i32_0 = arith.constant 0 : i32
    %2 = arith.cmpi ne, %1, %c0_i32_0 : i32
    scf.if %2 {
      %c0_12 = arith.constant 0 : index
      %c0_13 = arith.constant 0 : index
      %24 = vector.load %arg2[%c0_12, %c0_13] : memref<16x32xbf16, #tpu.memory_space<vmem>>, vector<16x32xbf16>
      %c0_14 = arith.constant 0 : index
      %c0_15 = arith.constant 0 : index
      %25 = vector.load %arg3[%c0_14, %c0_15] : memref<1x32xf32, #tpu.memory_space<vmem>>, vector<1x32xf32>
      %c0_16 = arith.constant 0 : index
      %c0_17 = arith.constant 0 : index
      %26 = vector.load %arg4[%c0_16, %c0_17] : memref<1x32xf32, #tpu.memory_space<vmem>>, vector<1x32xf32>
      %27 = arith.extf %24 : vector<16x32xbf16> to vector<16x32xf32>
      %cst_18 = arith.constant dense<0.000000e+00> : vector<16xf32>
      %28 = vector.multi_reduction <add>, %27, %cst_18 [1] : vector<16x32xf32> to vector<16xf32>
      %29 = vector.shape_cast %28 : vector<16xf32> to vector<16x1xf32>
      %cst_19 = arith.constant 3.200000e+01 : f32
      %30 = vector.broadcast %cst_19 : f32 to vector<16x1xf32>
      %31 = arith.divf %29, %30 : vector<16x1xf32>
      %32 = vector.broadcast %31 : vector<16x1xf32> to vector<16x32xf32>
      %33 = arith.subf %27, %32 : vector<16x32xf32>
      %34 = arith.mulf %33, %33 : vector<16x32xf32>
      %cst_20 = arith.constant dense<0.000000e+00> : vector<16xf32>
      %35 = vector.multi_reduction <add>, %34, %cst_20 [1] : vector<16x32xf32> to vector<16xf32>
      %36 = vector.shape_cast %35 : vector<16xf32> to vector<16x1xf32>
      %cst_21 = arith.constant 3.200000e+01 : f32
      %37 = vector.broadcast %cst_21 : f32 to vector<16x1xf32>
      %38 = arith.divf %36, %37 : vector<16x1xf32>
      %39 = vector.broadcast %31 : vector<16x1xf32> to vector<16x32xf32>
      %40 = arith.subf %27, %39 : vector<16x32xf32>
      %cst_22 = arith.constant 9.99999974E-6 : f32
      %41 = vector.broadcast %cst_22 : f32 to vector<16x1xf32>
      %42 = arith.addf %38, %41 : vector<16x1xf32>
      %43 = math.rsqrt %42 : vector<16x1xf32>
      %44 = vector.broadcast %43 : vector<16x1xf32> to vector<16x32xf32>
      %45 = arith.mulf %40, %44 : vector<16x32xf32>
      %46 = vector.broadcast %25 : vector<1x32xf32> to vector<16x32xf32>
      %47 = arith.mulf %45, %46 : vector<16x32xf32>
      %48 = vector.broadcast %26 : vector<1x32xf32> to vector<16x32xf32>
      %49 = arith.addf %47, %48 : vector<16x32xf32>
      %50 = arith.truncf %49 : vector<16x32xf32> to vector<16x32xbf16>
      %c0_23 = arith.constant 0 : index
      %c0_24 = arith.constant 0 : index
      %51 = vector.load %arg8[%c0_23, %c0_24] : memref<16x32xbf16, #tpu.memory_space<vmem>>, vector<16x32xbf16>
      tpu.vector_store %arg8[%c0_23, %c0_24], %50 {strides = array<i32>} : memref<16x32xbf16, #tpu.memory_space<vmem>>, vector<16x32xbf16>,
    } else {
    }
    %c0 = arith.constant 0 : index
    %c0_1 = arith.constant 0 : index
    %3 = vector.load %arg8[%c0, %c0_1] : memref<16x32xbf16, #tpu.memory_space<vmem>>, vector<16x32xbf16>
    %c0_2 = arith.constant 0 : index
    %c0_3 = arith.constant 0 : index
    %4 = vector.load %arg5[%c0_2, %c0_3] : memref<32x128xbf16, #tpu.memory_space<vmem>>, vector<32x128xbf16>
    %cst = arith.constant dense<0.000000e+00> : vector<16x128xf32>
    %5 = tpu.matmul %3, %4, %cst {dimension_numbers = #tpu.dot_dimension_numbers<[1], [0], [0], [1], [0, 0, 1, 1], [], []>} : vector<16x32xbf16>, vector<32x128xbf16>, vector<16x128xf32> -> vector<16x128xf32>
    %c0_4 = arith.constant 0 : index
    %c0_5 = arith.constant 0 : index
    %6 = vector.load %arg6[%c0_4, %c0_5] : memref<1x128xf32, #tpu.memory_space<vmem>>, vector<1x128xf32>
    %7 = vector.broadcast %6 : vector<1x128xf32> to vector<16x128xf32>
    %8 = arith.addf %5, %7 : vector<16x128xf32>
    %cst_6 = arith.constant 5.000000e-01 : f32
    %9 = vector.broadcast %cst_6 : f32 to vector<16x128xf32>
    %10 = arith.mulf %9, %8 : vector<16x128xf32>
    %cst_7 = arith.constant 4.471500e-02 : f32
    %11 = vector.broadcast %cst_7 : f32 to vector<16x128xf32>
    %12 = arith.mulf %11, %8 : vector<16x128xf32>
    %13 = arith.mulf %12, %8 : vector<16x128xf32>
    %14 = arith.mulf %13, %8 : vector<16x128xf32>
    %15 = arith.addf %8, %14 : vector<16x128xf32>
    %cst_8 = arith.constant 0.797884583 : f32
    %16 = vector.broadcast %cst_8 : f32 to vector<16x128xf32>
    %17 = arith.mulf %16, %15 : vector<16x128xf32>
    %18 = math.tanh %17 : vector<16x128xf32>
    %cst_9 = arith.constant 1.000000e+00 : f32
    %19 = vector.broadcast %cst_9 : f32 to vector<16x128xf32>
    %20 = arith.addf %19, %18 : vector<16x128xf32>
    %21 = arith.mulf %10, %20 : vector<16x128xf32>
    %22 = arith.truncf %21 : vector<16x128xf32> to vector<16x128xbf16>
    %c0_10 = arith.constant 0 : index
    %c0_11 = arith.constant 0 : index
    %23 = vector.load %arg7[%c0_10, %c0_11] : memref<16x128xbf16, #tpu.memory_space<vmem>>, vector<16x128xbf16>
    tpu.vector_store %arg7[%c0_10, %c0_11], %22 {strides = array<i32>} : memref<16x128xbf16, #tpu.memory_space<vmem>>, vector<16x128xbf16>,
    return
  }
  func.func @transform_0(%arg0: i32, %arg1: i32) -> (i32, i32) {
    %c0_i32 = arith.constant 0 : i32
    %c0_i32_0 = arith.constant 0 : i32
    return %arg0, %c0_i32 : i32, i32
  }
  func.func @transform_1(%arg0: i32, %arg1: i32) -> (i32, i32) {
    %c0_i32 = arith.constant 0 : i32
    %c0_i32_0 = arith.constant 0 : i32
    %c0_i32_1 = arith.constant 0 : i32
    return %c0_i32, %c0_i32_0 : i32, i32
  }
  func.func @transform_2(%arg0: i32, %arg1: i32) -> (i32, i32) {
    %c0_i32 = arith.constant 0 : i32
    %c0_i32_0 = arith.constant 0 : i32
    %c0_i32_1 = arith.constant 0 : i32
    return %c0_i32, %c0_i32_0 : i32, i32
  }
  func.func @transform_3(%arg0: i32, %arg1: i32) -> (i32, i32) {
    %c0_i32 = arith.constant 0 : i32
    %c0_i32_0 = arith.constant 0 : i32
    return %c0_i32, %arg1 : i32, i32
  }
  func.func @transform_4(%arg0: i32, %arg1: i32) -> (i32, i32) {
    %c0_i32 = arith.constant 0 : i32
    %c0_i32_0 = arith.constant 0 : i32
    return %c0_i32, %arg1 : i32, i32
  }
  func.func @transform_5(%arg0: i32, %arg1: i32) -> (i32, i32) {
    %c0_i32 = arith.constant 0 : i32
    return %arg0, %arg1 : i32, i32
  }
}

module attributes {stable_mosaic.version = 11 : i64} {
  func.func @linear_residual_kernel(%arg0: i32, %arg1: i32, %arg2: memref<16x128xbf16, #tpu.memory_space<vmem>>, %arg3: memref<128x32xbf16, #tpu.memory_space<vmem>>, %arg4: memref<1x32xf32, #tpu.memory_space<vmem>>, %arg5: memref<16x32xbf16, #tpu.memory_space<vmem>>, %arg6: memref<16x32xbf16, #tpu.memory_space<vmem>>, %arg7: memref<16x32xf32, #tpu.memory_space<vmem>>) attributes {dimension_semantics = [#tpu.dimension_semantics<parallel>, #tpu.dimension_semantics<arbitrary>], iteration_bounds = array<i64: 1, 1>, scalar_prefetch = 0 : i64, scratch_operands = 1 : i64, tpu.core_type = #tpu.core_type<tc>, window_params = [{transform_indices = @transform_0, window_bounds = array<i64: 16, 128>}, {transform_indices = @transform_1, window_bounds = array<i64: 128, 32>}, {pipeline_mode = #tpu.pipeline_mode<synchronous>, transform_indices = @transform_2, window_bounds = array<i64: 1, 32>}, {transform_indices = @transform_3, window_bounds = array<i64: 16, 32>}, {transform_indices = @transform_4, window_bounds = array<i64: 16, 32>}]} {
    %c0_i32 = arith.constant 0 : i32
    %0 = arith.cmpi eq, %arg1, %c0_i32 : i32
    %1 = arith.extui %0 : i1 to i32
    %c0_i32_0 = arith.constant 0 : i32
    %2 = arith.cmpi ne, %1, %c0_i32_0 : i32
    scf.if %2 {
      %c0_10 = arith.constant 0 : index
      %c0_11 = arith.constant 0 : index
      %12 = vector.load %arg5[%c0_10, %c0_11] : memref<16x32xbf16, #tpu.memory_space<vmem>>, vector<16x32xbf16>
      %13 = arith.extf %12 : vector<16x32xbf16> to vector<16x32xf32>
      %c0_12 = arith.constant 0 : index
      %c0_13 = arith.constant 0 : index
      %14 = vector.load %arg4[%c0_12, %c0_13] : memref<1x32xf32, #tpu.memory_space<vmem>>, vector<1x32xf32>
      %15 = vector.broadcast %14 : vector<1x32xf32> to vector<16x32xf32>
      %16 = arith.addf %13, %15 : vector<16x32xf32>
      %c0_14 = arith.constant 0 : index
      %c0_15 = arith.constant 0 : index
      %17 = vector.load %arg7[%c0_14, %c0_15] : memref<16x32xf32, #tpu.memory_space<vmem>>, vector<16x32xf32>
      tpu.vector_store %arg7[%c0_14, %c0_15], %16 {strides = array<i32>} : memref<16x32xf32, #tpu.memory_space<vmem>>, vector<16x32xf32>,
    } else {
    }
    %c0 = arith.constant 0 : index
    %c0_1 = arith.constant 0 : index
    %3 = vector.load %arg7[%c0, %c0_1] : memref<16x32xf32, #tpu.memory_space<vmem>>, vector<16x32xf32>
    %c0_2 = arith.constant 0 : index
    %c0_3 = arith.constant 0 : index
    %4 = vector.load %arg2[%c0_2, %c0_3] : memref<16x128xbf16, #tpu.memory_space<vmem>>, vector<16x128xbf16>
    %c0_4 = arith.constant 0 : index
    %c0_5 = arith.constant 0 : index
    %5 = vector.load %arg3[%c0_4, %c0_5] : memref<128x32xbf16, #tpu.memory_space<vmem>>, vector<128x32xbf16>
    %cst = arith.constant dense<0.000000e+00> : vector<16x32xf32>
    %6 = tpu.matmul %4, %5, %cst {dimension_numbers = #tpu.dot_dimension_numbers<[1], [0], [0], [1], [0, 0, 1, 1], [], []>} : vector<16x128xbf16>, vector<128x32xbf16>, vector<16x32xf32> -> vector<16x32xf32>
    %7 = arith.addf %3, %6 : vector<16x32xf32>
    %c0_6 = arith.constant 0 : index
    %c0_7 = arith.constant 0 : index
    %8 = vector.load %arg7[%c0_6, %c0_7] : memref<16x32xf32, #tpu.memory_space<vmem>>, vector<16x32xf32>
    tpu.vector_store %arg7[%c0_6, %c0_7], %7 {strides = array<i32>} : memref<16x32xf32, #tpu.memory_space<vmem>>, vector<16x32xf32>,
    %c0_i32_8 = arith.constant 0 : i32
    %9 = arith.cmpi eq, %arg1, %c0_i32_8 : i32
    %10 = arith.extui %9 : i1 to i32
    %c0_i32_9 = arith.constant 0 : i32
    %11 = arith.cmpi ne, %10, %c0_i32_9 : i32
    scf.if %11 {
      %c0_10 = arith.constant 0 : index
      %c0_11 = arith.constant 0 : index
      %12 = vector.load %arg7[%c0_10, %c0_11] : memref<16x32xf32, #tpu.memory_space<vmem>>, vector<16x32xf32>
      %13 = arith.truncf %12 : vector<16x32xf32> to vector<16x32xbf16>
      %c0_12 = arith.constant 0 : index
      %c0_13 = arith.constant 0 : index
      %14 = vector.load %arg6[%c0_12, %c0_13] : memref<16x32xbf16, #tpu.memory_space<vmem>>, vector<16x32xbf16>
      tpu.vector_store %arg6[%c0_12, %c0_13], %13 {strides = array<i32>} : memref<16x32xbf16, #tpu.memory_space<vmem>>, vector<16x32xbf16>,
    } else {
    }
    return
  }
  func.func @transform_0(%arg0: i32, %arg1: i32) -> (i32, i32) {
    %c0_i32 = arith.constant 0 : i32
    return %arg0, %arg1 : i32, i32
  }
  func.func @transform_1(%arg0: i32, %arg1: i32) -> (i32, i32) {
    %c0_i32 = arith.constant 0 : i32
    %c0_i32_0 = arith.constant 0 : i32
    return %arg1, %c0_i32 : i32, i32
  }
  func.func @transform_2(%arg0: i32, %arg1: i32) -> (i32, i32) {
    %c0_i32 = arith.constant 0 : i32
    %c0_i32_0 = arith.constant 0 : i32
    %c0_i32_1 = arith.constant 0 : i32
    return %c0_i32, %c0_i32_0 : i32, i32
  }
  func.func @transform_3(%arg0: i32, %arg1: i32) -> (i32, i32) {
    %c0_i32 = arith.constant 0 : i32
    %c0_i32_0 = arith.constant 0 : i32
    return %arg0, %c0_i32 : i32, i32
  }
  func.func @transform_4(%arg0: i32, %arg1: i32) -> (i32, i32) {
    %c0_i32 = arith.constant 0 : i32
    %c0_i32_0 = arith.constant 0 : i32
    return %arg0, %c0_i32 : i32, i32
  }
}

module attributes {stable_mosaic.version = 11 : i64} {
  func.func @ln_linear_kernel(%arg0: i32, %arg1: i32, %arg2: memref<16x32xbf16, #tpu.memory_space<vmem>>, %arg3: memref<1x32xf32, #tpu.memory_space<vmem>>, %arg4: memref<1x32xf32, #tpu.memory_space<vmem>>, %arg5: memref<32x128xbf16, #tpu.memory_space<vmem>>, %arg6: memref<1x128xf32, #tpu.memory_space<vmem>>, %arg7: memref<16x128xbf16, #tpu.memory_space<vmem>>, %arg8: memref<16x32xbf16, #tpu.memory_space<vmem>>) attributes {dimension_semantics = [#tpu.dimension_semantics<parallel>, #tpu.dimension_semantics<arbitrary>], iteration_bounds = array<i64: 1, 1>, scalar_prefetch = 0 : i64, scratch_operands = 1 : i64, tpu.core_type = #tpu.core_type<tc>, window_params = [{transform_indices = @transform_0, window_bounds = array<i64: 16, 32>}, {pipeline_mode = #tpu.pipeline_mode<synchronous>, transform_indices = @transform_1, window_bounds = array<i64: 1, 32>}, {pipeline_mode = #tpu.pipeline_mode<synchronous>, transform_indices = @transform_2, window_bounds = array<i64: 1, 32>}, {transform_indices = @transform_3, window_bounds = array<i64: 32, 128>}, {transform_indices = @transform_4, window_bounds = array<i64: 1, 128>}, {transform_indices = @transform_5, window_bounds = array<i64: 16, 128>}]} {
    %c0_i32 = arith.constant 0 : i32
    %0 = arith.cmpi eq, %arg1, %c0_i32 : i32
    %1 = arith.extui %0 : i1 to i32
    %c0_i32_0 = arith.constant 0 : i32
    %2 = arith.cmpi ne, %1, %c0_i32_0 : i32
    scf.if %2 {
      %c0_8 = arith.constant 0 : index
      %c0_9 = arith.constant 0 : index
      %11 = vector.load %arg2[%c0_8, %c0_9] : memref<16x32xbf16, #tpu.memory_space<vmem>>, vector<16x32xbf16>
      %c0_10 = arith.constant 0 : index
      %c0_11 = arith.constant 0 : index
      %12 = vector.load %arg3[%c0_10, %c0_11] : memref<1x32xf32, #tpu.memory_space<vmem>>, vector<1x32xf32>
      %c0_12 = arith.constant 0 : index
      %c0_13 = arith.constant 0 : index
      %13 = vector.load %arg4[%c0_12, %c0_13] : memref<1x32xf32, #tpu.memory_space<vmem>>, vector<1x32xf32>
      %14 = arith.extf %11 : vector<16x32xbf16> to vector<16x32xf32>
      %cst_14 = arith.constant dense<0.000000e+00> : vector<16xf32>
      %15 = vector.multi_reduction <add>, %14, %cst_14 [1] : vector<16x32xf32> to vector<16xf32>
      %16 = vector.shape_cast %15 : vector<16xf32> to vector<16x1xf32>
      %cst_15 = arith.constant 3.200000e+01 : f32
      %17 = vector.broadcast %cst_15 : f32 to vector<16x1xf32>
      %18 = arith.divf %16, %17 : vector<16x1xf32>
      %19 = vector.broadcast %18 : vector<16x1xf32> to vector<16x32xf32>
      %20 = arith.subf %14, %19 : vector<16x32xf32>
      %21 = arith.mulf %20, %20 : vector<16x32xf32>
      %cst_16 = arith.constant dense<0.000000e+00> : vector<16xf32>
      %22 = vector.multi_reduction <add>, %21, %cst_16 [1] : vector<16x32xf32> to vector<16xf32>
      %23 = vector.shape_cast %22 : vector<16xf32> to vector<16x1xf32>
      %cst_17 = arith.constant 3.200000e+01 : f32
      %24 = vector.broadcast %cst_17 : f32 to vector<16x1xf32>
      %25 = arith.divf %23, %24 : vector<16x1xf32>
      %26 = vector.broadcast %18 : vector<16x1xf32> to vector<16x32xf32>
      %27 = arith.subf %14, %26 : vector<16x32xf32>
      %cst_18 = arith.constant 9.99999974E-6 : f32
      %28 = vector.broadcast %cst_18 : f32 to vector<16x1xf32>
      %29 = arith.addf %25, %28 : vector<16x1xf32>
      %30 = math.rsqrt %29 : vector<16x1xf32>
      %31 = vector.broadcast %30 : vector<16x1xf32> to vector<16x32xf32>
      %32 = arith.mulf %27, %31 : vector<16x32xf32>
      %33 = vector.broadcast %12 : vector<1x32xf32> to vector<16x32xf32>
      %34 = arith.mulf %32, %33 : vector<16x32xf32>
      %35 = vector.broadcast %13 : vector<1x32xf32> to vector<16x32xf32>
      %36 = arith.addf %34, %35 : vector<16x32xf32>
      %37 = arith.truncf %36 : vector<16x32xf32> to vector<16x32xbf16>
      %c0_19 = arith.constant 0 : index
      %c0_20 = arith.constant 0 : index
      %38 = vector.load %arg8[%c0_19, %c0_20] : memref<16x32xbf16, #tpu.memory_space<vmem>>, vector<16x32xbf16>
      tpu.vector_store %arg8[%c0_19, %c0_20], %37 {strides = array<i32>} : memref<16x32xbf16, #tpu.memory_space<vmem>>, vector<16x32xbf16>,
    } else {
    }
    %c0 = arith.constant 0 : index
    %c0_1 = arith.constant 0 : index
    %3 = vector.load %arg8[%c0, %c0_1] : memref<16x32xbf16, #tpu.memory_space<vmem>>, vector<16x32xbf16>
    %c0_2 = arith.constant 0 : index
    %c0_3 = arith.constant 0 : index
    %4 = vector.load %arg5[%c0_2, %c0_3] : memref<32x128xbf16, #tpu.memory_space<vmem>>, vector<32x128xbf16>
    %cst = arith.constant dense<0.000000e+00> : vector<16x128xf32>
    %5 = tpu.matmul %3, %4, %cst {dimension_numbers = #tpu.dot_dimension_numbers<[1], [0], [0], [1], [0, 0, 1, 1], [], []>} : vector<16x32xbf16>, vector<32x128xbf16>, vector<16x128xf32> -> vector<16x128xf32>
    %c0_4 = arith.constant 0 : index
    %c0_5 = arith.constant 0 : index
    %6 = vector.load %arg6[%c0_4, %c0_5] : memref<1x128xf32, #tpu.memory_space<vmem>>, vector<1x128xf32>
    %7 = vector.broadcast %6 : vector<1x128xf32> to vector<16x128xf32>
    %8 = arith.addf %5, %7 : vector<16x128xf32>
    %9 = arith.truncf %8 : vector<16x128xf32> to vector<16x128xbf16>
    %c0_6 = arith.constant 0 : index
    %c0_7 = arith.constant 0 : index
    %10 = vector.load %arg7[%c0_6, %c0_7] : memref<16x128xbf16, #tpu.memory_space<vmem>>, vector<16x128xbf16>
    tpu.vector_store %arg7[%c0_6, %c0_7], %9 {strides = array<i32>} : memref<16x128xbf16, #tpu.memory_space<vmem>>, vector<16x128xbf16>,
    return
  }
  func.func @transform_0(%arg0: i32, %arg1: i32) -> (i32, i32) {
    %c0_i32 = arith.constant 0 : i32
    %c0_i32_0 = arith.constant 0 : i32
    return %arg0, %c0_i32 : i32, i32
  }
  func.func @transform_1(%arg0: i32, %arg1: i32) -> (i32, i32) {
    %c0_i32 = arith.constant 0 : i32
    %c0_i32_0 = arith.constant 0 : i32
    %c0_i32_1 = arith.constant 0 : i32
    return %c0_i32, %c0_i32_0 : i32, i32
  }
  func.func @transform_2(%arg0: i32, %arg1: i32) -> (i32, i32) {
    %c0_i32 = arith.constant 0 : i32
    %c0_i32_0 = arith.constant 0 : i32
    %c0_i32_1 = arith.constant 0 : i32
    return %c0_i32, %c0_i32_0 : i32, i32
  }
  func.func @transform_3(%arg0: i32, %arg1: i32) -> (i32, i32) {
    %c0_i32 = arith.constant 0 : i32
    %c0_i32_0 = arith.constant 0 : i32
    return %c0_i32, %arg1 : i32, i32
  }
  func.func @transform_4(%arg0: i32, %arg1: i32) -> (i32, i32) {
    %c0_i32 = arith.constant 0 : i32
    %c0_i32_0 = arith.constant 0 : i32
    return %c0_i32, %arg1 : i32, i32
  }
  func.func @transform_5(%arg0: i32, %arg1: i32) -> (i32, i32) {
    %c0_i32 = arith.constant 0 : i32
    return %arg0, %arg1 : i32, i32
  }
}

</mosaic_0001>

<bundles_post_ra>
// kernel: gpt_forward.13
= control target key start
LH: loop header
LB: loop body
LE: loop exit
PB: predicated region body
PF: predicated region fallthrough
CT: control target
= control target key end

     0   :  { %v161_v0 = vmov 0.0   ;;  %vm162_vm0 = vmmov 0   ;;  %vm35_vm1 = vcmask 261120   ;;  %vm125_vm2 = vcmask 257024   ;;  %s214_s1 = inlined_call_operand.vmem [shape: bf16[32,32], index: 1, kind: input, shape index: {}]   ;;  %s215_s2 = inlined_call_operand.vmem [shape: f32[1,32], index: 2, kind: input, shape index: {}]   ;;  %s216_s3 = inlined_call_operand.vmem [shape: bf16[16,32], index: 3, kind: input, shape index: {}]   ;;  %s217_s0 = inlined_call_operand.vmem [shape: bf16[16,32], index: 0, kind: input, shape index: {}]   ;;  %s218_s4 = inlined_call_operand.vmem [shape: bf16[16,32], index: 4, kind: output, shape index: {}]  }
   0x1   :  { %148 = vmatprep.subr.bf16.mxu0 %v161_v0  ;;  %v158_v1 = vld [vmem:[%s214_s1] sm:$0xff]   ;;  %152 = vmatprep.mubr.msk.bf16.mxu0 %vm162_vm0, %v161_v0  ;;  %v159_v2 = vld [vmem:[%s214_s1 + $0x8] sm:$0xff]  }
   0x2   :  { %149 = vmatpush3.bf16.msra.mxu0 %v158_v1  ;;  %v142_v3 = vld [vmem:[%s216_s3] sm:$0xff]  }
   0x3   :  { %150 = vmatprep.subr.bf16.mxu0 %v161_v0  ;;  %v132_v4 = vld [vmem:[%s215_s2] ss:$0 sm:$0xff]  ;;  %v143_v5 = vunpack.c.l.bf16 %v142_v3  ;;  %v144_v8 = vunpack.c.h.bf16 %v142_v3 }
   0x4   :  { %v160_v6 = vld [vmem:[%s217_s0] sm:$0xff]  }
   0x5   :  { %v33_v7 = vadd.f32 %v143_v5, %v132_v4  ;;  %v34_v9 = vadd.f32 %v144_v8, %v132_v4 }
   0x6   :  { %151 = vmatpush3.bf16.msra.mxu0 %v159_v2 }
   0x7   :  { %36 = vst.msk [vmem:[#allocation2] sm:$0xff] %vm35_vm1, %v33_v7  ;;  %37 = vst.msk [vmem:[#allocation2 + $0x8] sm:$0xff] %vm35_vm1, %v34_v9 }
   0x9   :  { %153 = vmatmul.mubr.msk.bf16.vlgmr.msra.gmra.mrb[0].mxu0 %vm35_vm1, %v160_v6 }
   0xe   :  { %v38_v10 = vld [vmem:[#allocation2] sm:$0xff]  ;;  %v39_v12 = vld [vmem:[#allocation2 + $0x8] sm:$0xff] }
  0xdc   :  { %v101_v11 = vpop.f32.mrb[0].mxu0 }
  0xdd   :  { %v108_v13 = vadd.f32 %v101_v11, %v38_v10  ;;  %v154_v14 = vpop.f32.mrb[1].mxu0 }
  0xde   :  { %v104_v15 = vpop.f32.mrb[2].mxu0 }
  0xdf   :  { %110 = vst.msk [vmem:[#allocation2] sm:$0xff] %vm35_vm1, %v108_v13  ;;  %v109_v16 = vadd.f32 %v104_v15, %v39_v12  ;;  %v155_v17 = vpop.f32.mrb[3].mxu0 }
  0xe1   :  { %111 = vst.msk [vmem:[#allocation2 + $0x8] sm:$0xff] %vm35_vm1, %v109_v16 }
  0xe6   :  { %v115_v18 = vld [vmem:[#allocation2] sm:$0xff] }
  0xe7   :  { %v139_v19 = vpack.c.bf16 %v115_v18, %v115_v18 }
  0xe8   :  { %v116_v20 = vld [vmem:[#allocation2 + $0x8] sm:$0xff] }
  0xe9   :  { %126 = vst.msk [vmem:[%s218_s4] sm:$0xf] %vm125_vm2, %v139_v19  ;;  %v140_v21 = vpack.c.bf16 %v116_v20, %v116_v20 }
  0xeb   :  { %127 = vst.msk [vmem:[%s218_s4 + $0x4] sm:$0xf] %vm125_vm2, %v140_v21 }

// kernel: gpt_forward.11
= control target key start
LH: loop header
LB: loop body
LE: loop exit
PB: predicated region body
PF: predicated region fallthrough
CT: control target
= control target key end

     0   :  { %vm31_vm0 = vcmask 261120   ;;  %v194_v16 = vmov 0.0   ;;  %vm195_vm1 = vmmov 0   ;;  %vm154_vm2 = vcmask 781312   ;;  %s256_s0 = inlined_call_operand.vmem [shape: bf16[16,32], index: 0, kind: input, shape index: {}]   ;;  %s257_s3 = inlined_call_operand.vmem [shape: bf16[32,96], index: 3, kind: input, shape index: {}]   ;;  %s258_s1 = inlined_call_operand.vmem [shape: f32[1,32], index: 1, kind: input, shape index: {}]   ;;  %s259_s2 = inlined_call_operand.vmem [shape: f32[1,32], index: 2, kind: input, shape index: {}]   ;;  %s260_s4 = inlined_call_operand.vmem [shape: f32[1,96], index: 4, kind: input, shape index: {}]   ;;  %s261_s5 = inlined_call_operand.vmem [shape: bf16[16,96], index: 5, kind: output, shape index: {}]  }
   0x1   :  { %v172_v0 = vld [vmem:[%s256_s0] sm:$0xff]   ;;  %178 = vmatprep.subr.bf16.mxu0 %v194_v16  ;;  %v189_v17 = vld [vmem:[%s257_s3 + $0x8] sm:$0xff]   ;;  %182 = vmatprep.mubr.msk.bf16.mxu0 %vm195_vm1, %v194_v16 }
   0x2   :  { %v173_v1 = vunpack.c.l.bf16 %v172_v0  ;;  %v174_v2 = vunpack.c.h.bf16 %v172_v0  ;;  %v188_v15 = vld [vmem:[%s257_s3] sm:$0xff]  }
   0x3   :  { %179 = vmatpush3.bf16.msra.mxu0 %v188_v15  ;;  %v161_v26 = vld [vmem:[%s258_s1] ss:$0 sm:$0xff] }
   0x4   :  { %v32_v3 = vsel %vm31_vm0, %v173_v1, 0.0  ;;  %v35_v4 = vsel %vm31_vm0, %v174_v2, 0.0  ;;  %180 = vmatprep.subr.bf16.mxu0 %v194_v16  ;;  %v162_v30 = vld [vmem:[%s259_s2] ss:$0 sm:$0xff] }
   0x5   :  { %33 = vadd.xlane.f32.xlu0 %v32_v3  ;;  %v163_v36 = vld [vmem:[%s260_s4] ss:$0 sm:$0xff] }
   0x7   :  { %181 = vmatpush3.bf16.msra.mxu0 %v189_v17 }
   0x9   :  { %36 = vadd.xlane.f32.xlu0 %v35_v4 }
  0x92   :  { %v34_v5 = vpop.xlane.xlu0 %33 }
  0x93   :  { %v39_v6 = vmul.f32 0.03125, %v34_v5 }
  0x95   :  { %v41_v7 = vsub.f32 %v173_v1, %v39_v6 }
  0x96   :  { %v37_v8 = vpop.xlane.xlu0 %36 }
  0x97   :  { %v40_v9 = vmul.f32 0.03125, %v37_v8  ;;  %v43_v10 = vmul.f32 %v41_v7, %v41_v7 }
  0x99   :  { %v42_v11 = vsub.f32 %v174_v2, %v40_v9  ;;  %v45_v12 = vsel %vm31_vm0, %v43_v10, 0.0 }
  0x9a   :  { %46 = vadd.xlane.f32.xlu1 %v45_v12 }
  0x9b   :  { %v44_v13 = vmul.f32 %v42_v11, %v42_v11 }
  0x9d   :  { %v48_v14 = vsel %vm31_vm0, %v44_v13, 0.0 }
  0x9e   :  { %49 = vadd.xlane.f32.xlu1 %v48_v14 }
 0x127   :  { %v47_v18 = vpop.xlane.xlu1 %46 }
 0x128   :  { %v51_v19 = vmul.f32 0.03125, %v47_v18 }
 0x12a   :  { %v53_v20 = vadd.f32 1e-05, %v51_v19 }
 0x12b   :  { %v50_v21 = vpop.xlane.xlu1 %49 }
 0x12c   :  { %190 = vrsqrt.f32 %v53_v20  ;;  %v52_v22 = vmul.f32 0.03125, %v50_v21 }
 0x12e   :  { %v54_v23 = vadd.f32 1e-05, %v52_v22 }
 0x130   :  { %192 = vrsqrt.f32 %v54_v23 }
 0x136   :  { %v191_v24 = vpop.eup %190 }
 0x137   :  { %v57_v25 = vmul.f32 %v191_v24, %v41_v7 }
 0x139   :  { %v65_v28 = vmul.f32 %v161_v26, %v57_v25 }
 0x13a   :  { %v193_v27 = vpop.eup %192 }
 0x13b   :  { %v58_v29 = vmul.f32 %v193_v27, %v42_v11  ;;  %v73_v32 = vadd.f32 %v162_v30, %v65_v28 }
 0x13d   :  { %v66_v31 = vmul.f32 %v161_v26, %v58_v29 }
 0x13f   :  { %v74_v33 = vadd.f32 %v162_v30, %v66_v31 }
 0x141   :  { %v75_v34 = vpack.c.bf16 %v74_v33, %v73_v32 }
 0x143   :  { %76 = vst.msk [vmem:[#allocation2] sm:$0xff] %vm31_vm0, %v75_v34 }
 0x14a   :  { %v77_v35 = vld [vmem:[#allocation2] sm:$0xff] }
 0x14b   :  { %183 = vmatmul.mubr.msk.bf16.vlgmr.msra.gmra.mrb[0].mxu0 %vm31_vm0, %v77_v35 }
 0x21e   :  { %v139_v37 = vpop.f32.mrb[0].mxu0 }
 0x21f   :  { %v140_v38 = vadd.f32 %v163_v36, %v139_v37  ;;  %v184_v39 = vpop.f32.mrb[1].mxu0 }
 0x220   :  { %v142_v40 = vpop.f32.mrb[2].mxu0 }
 0x221   :  { %v169_v41 = vpack.c.bf16 %v140_v38, %v140_v38  ;;  %v143_v42 = vadd.f32 %v163_v36, %v142_v40  ;;  %v185_v43 = vpop.f32.mrb[3].mxu0 }
 0x223   :  { %155 = vst.msk [vmem:[%s261_s5] sm:$0xf] %vm154_vm2, %v169_v41  ;;  %v170_v44 = vpack.c.bf16 %v143_v42, %v143_v42 }
 0x225   :  { %156 = vst.msk [vmem:[%s261_s5 + $0x4] sm:$0xf] %vm154_vm2, %v170_v44 }

// kernel: gpt_forward.14
= control target key start
LH: loop header
LB: loop body
LE: loop exit
PB: predicated region body
PF: predicated region fallthrough
CT: control target
= control target key end

     0   :  { %vm31_vm0 = vcmask 261120   ;;  %v220_v16 = vmov 0.0   ;;  %vm221_vm1 = vmmov 0   ;;  %s279_s0 = inlined_call_operand.vmem [shape: bf16[16,32], index: 0, kind: input, shape index: {}]   ;;  %s280_s3 = inlined_call_operand.vmem [shape: bf16[32,128], index: 3, kind: input, shape index: {}]   ;;  %s281_s1 = inlined_call_operand.vmem [shape: f32[1,32], index: 1, kind: input, shape index: {}]   ;;  %s282_s2 = inlined_call_operand.vmem [shape: f32[1,32], index: 2, kind: input, shape index: {}]   ;;  %s283_s4 = inlined_call_operand.vmem [shape: f32[1,128], index: 4, kind: input, shape index: {}]   ;;  %s284_s5 = inlined_call_operand.vmem [shape: bf16[16,128], index: 5, kind: output, shape index: {}]  }
   0x1   :  { %v189_v0 = vld [vmem:[%s279_s0] sm:$0xff]   ;;  %200 = vmatprep.subr.bf16.mxu0 %v220_v16  ;;  %v211_v17 = vld [vmem:[%s280_s3 + $0x8] sm:$0xff]   ;;  %204 = vmatprep.mubr.msk.bf16.mxu0 %vm221_vm1, %v220_v16 }
   0x2   :  { %v190_v1 = vunpack.c.l.bf16 %v189_v0  ;;  %v191_v2 = vunpack.c.h.bf16 %v189_v0  ;;  %v210_v15 = vld [vmem:[%s280_s3] sm:$0xff]  }
   0x3   :  { %201 = vmatpush3.bf16.msra.mxu0 %v210_v15  ;;  %v178_v26 = vld [vmem:[%s281_s1] ss:$0 sm:$0xff] }
   0x4   :  { %v32_v3 = vsel %vm31_vm0, %v190_v1, 0.0  ;;  %v35_v4 = vsel %vm31_vm0, %v191_v2, 0.0  ;;  %202 = vmatprep.subr.bf16.mxu0 %v220_v16  ;;  %v179_v30 = vld [vmem:[%s282_s2] ss:$0 sm:$0xff] }
   0x5   :  { %33 = vadd.xlane.f32.xlu0 %v32_v3  ;;  %v180_v36 = vld [vmem:[%s283_s4] ss:$0 sm:$0xff] }
   0x7   :  { %203 = vmatpush3.bf16.msra.mxu0 %v211_v17 }
   0x9   :  { %36 = vadd.xlane.f32.xlu0 %v35_v4 }
  0x92   :  { %v34_v5 = vpop.xlane.xlu0 %33 }
  0x93   :  { %v39_v6 = vmul.f32 0.03125, %v34_v5 }
  0x95   :  { %v41_v7 = vsub.f32 %v190_v1, %v39_v6 }
  0x96   :  { %v37_v8 = vpop.xlane.xlu0 %36 }
  0x97   :  { %v40_v9 = vmul.f32 0.03125, %v37_v8  ;;  %v43_v10 = vmul.f32 %v41_v7, %v41_v7 }
  0x99   :  { %v42_v11 = vsub.f32 %v191_v2, %v40_v9  ;;  %v45_v12 = vsel %vm31_vm0, %v43_v10, 0.0 }
  0x9a   :  { %46 = vadd.xlane.f32.xlu1 %v45_v12 }
  0x9b   :  { %v44_v13 = vmul.f32 %v42_v11, %v42_v11 }
  0x9d   :  { %v48_v14 = vsel %vm31_vm0, %v44_v13, 0.0 }
  0x9e   :  { %49 = vadd.xlane.f32.xlu1 %v48_v14 }
 0x127   :  { %v47_v18 = vpop.xlane.xlu1 %46 }
 0x128   :  { %v51_v19 = vmul.f32 0.03125, %v47_v18 }
 0x12a   :  { %v53_v20 = vadd.f32 1e-05, %v51_v19 }
 0x12b   :  { %v50_v21 = vpop.xlane.xlu1 %49 }
 0x12c   :  { %212 = vrsqrt.f32 %v53_v20  ;;  %v52_v22 = vmul.f32 0.03125, %v50_v21 }
 0x12e   :  { %v54_v23 = vadd.f32 1e-05, %v52_v22 }
 0x130   :  { %214 = vrsqrt.f32 %v54_v23 }
 0x136   :  { %v213_v24 = vpop.eup %212 }
 0x137   :  { %v57_v25 = vmul.f32 %v213_v24, %v41_v7 }
 0x139   :  { %v65_v28 = vmul.f32 %v178_v26, %v57_v25 }
 0x13a   :  { %v215_v27 = vpop.eup %214 }
 0x13b   :  { %v58_v29 = vmul.f32 %v215_v27, %v42_v11  ;;  %v73_v32 = vadd.f32 %v179_v30, %v65_v28 }
 0x13d   :  { %v66_v31 = vmul.f32 %v178_v26, %v58_v29 }
 0x13f   :  { %v74_v33 = vadd.f32 %v179_v30, %v66_v31 }
 0x141   :  { %v75_v34 = vpack.c.bf16 %v74_v33, %v73_v32 }
 0x143   :  { %76 = vst.msk [vmem:[#allocation2] sm:$0xff] %vm31_vm0, %v75_v34 }
 0x14a   :  { %v77_v35 = vld [vmem:[#allocation2] sm:$0xff] }
 0x14b   :  { %205 = vmatmul.mubr.msk.bf16.vlgmr.msra.gmra.mrb[0].mxu0 %vm31_vm0, %v77_v35 }
 0x21e   :  { %v139_v37 = vpop.f32.mrb[0].mxu0 }
 0x21f   :  { %v140_v38 = vadd.f32 %v180_v36, %v139_v37  ;;  %v206_v39 = vpop.f32.mrb[1].mxu0 }
 0x220   :  { %v142_v40 = vpop.f32.mrb[2].mxu0 }
 0x221   :  { %v148_v41 = vmul.f32 0.044715, %v140_v38  ;;  %v143_v42 = vadd.f32 %v180_v36, %v142_v40  ;;  %v207_v43 = vpop.f32.mrb[3].mxu0  ;;  %v146_v56 = vmul.f32 0.5, %v140_v38 }
 0x223   :  { %v150_v44 = vmul.f32 %v148_v41, %v140_v38  ;;  %v149_v45 = vmul.f32 0.044715, %v143_v42  ;;  %v147_v57 = vmul.f32 0.5, %v143_v42 }
 0x225   :  { %v152_v46 = vmul.f32 %v150_v44, %v140_v38  ;;  %v151_v47 = vmul.f32 %v149_v45, %v143_v42 }
 0x227   :  { %v154_v48 = vadd.f32 %v152_v46, %v140_v38  ;;  %v153_v49 = vmul.f32 %v151_v47, %v143_v42 }
 0x229   :  { %v156_v50 = vmul.f32 0.7978846, %v154_v48  ;;  %v155_v51 = vadd.f32 %v153_v49, %v143_v42 }
 0x22b   :  { %216 = vtanh.f32 %v156_v50  ;;  %v157_v52 = vmul.f32 0.7978846, %v155_v51 }
 0x22d   :  { %218 = vtanh.f32 %v157_v52 }
 0x235   :  { %v217_v53 = vpop.eup %216 }
 0x236   :  { %v160_v54 = vadd.f32 1.0, %v217_v53 }
 0x237   :  { %v219_v55 = vpop.eup %218 }
 0x238   :  { %v161_v58 = vadd.f32 1.0, %v219_v55  ;;  %v162_v59 = vmul.f32 %v160_v54, %v146_v56 }
 0x23a   :  { %v163_v60 = vmul.f32 %v161_v58, %v147_v57 }
 0x23c   :  { %v195_v61 = vpack.c.bf16 %v163_v60, %v162_v59 }
 0x23e   :  { %196 = vst [vmem:[%s284_s5] sm:$0xff] %v195_v61  }

// kernel: gpt_forward.12
= control target key start
LH: loop header
LB: loop body
LE: loop exit
PB: predicated region body
PF: predicated region fallthrough
CT: control target
= control target key end

     0   :  { %s1267_s12 = smov 0   ;;  %s1269_s13 = smov 0   ;;  %s1486_s0 = inlined_call_operand.vmem [shape: bf16[2,8,32], index: 0, kind: input, shape index: {}]   ;;  %s1487_s1 = inlined_call_operand.vmem [shape: bf16[2,8,32], index: 1, kind: input, shape index: {}]   ;;  %s1488_s2 = inlined_call_operand.vmem [shape: bf16[2,8,32], index: 2, kind: input, shape index: {}]   ;;  %s1489_s3 = inlined_call_operand.vmem [shape: bf16[2,8,32], index: 3, kind: output, shape index: {}]  }
   0x1   :  { %s1271_s14 = smov 0  }
   0x2 LB: > { %s32_s15 = sadd.s32 1, %s1228_s13  ;;  %p1039_p0 = scmp.ge.s32.totalorder %s1232_s14, 1  ;;  %s1232_s14 = sphi %s1271_s14, %s13_s14   ;;  %s1228_s13 = sphi %s1269_s13, %s1491_s13   ;;  %s1224_s12 = sphi %s1267_s12, %s1490_s12  }
   0x3   : > { %p34_p1 = scmp.ge.s32.totalorder %s32_s15, 2  ;;  %p190_p2 = scmp.lt.s32.totalorder %s1232_s14, 3 }
   0x5   : > { %s1493_s15 = smov (%p34_p1, %s32_s15), 0  ;;  %p191_p3 = pnand %p1039_p0, %p190_p2 }
   0x6   : > { %p232_p4 = scmp.lt.s32.totalorder (!%p191_p3), %s1224_s12, 1  ;;  %v1234_v0 = vmov (!%p191_p3), 0.0   ;;  %vm1235_vm0 = vmmov (!%p191_p3), 0   ;;  %vm290_vm1 = vcmask (!%p191_p3), 64512   ;;  %vm265_vm2 = vcmask (!%p191_p3), 31744   ;;  %s1238_s23 = smov (!%p191_p3), 120  }
   0x7   : > { %194 = sbr.rel (%p191_p3) target bundleno = 1426 (0x592), region = 32  ;;  %1079 = vmatprep.subr.bf16.mxu0 (!%p191_p3), %v1234_v0  ;;  %1081 = vmatprep.mubr.msk.bf16.mxu0 (!%p191_p3), %vm1235_vm0, %v1234_v0  ;;  %v1236_v4 = vmov (!%p191_p3), -1e+30   ;;  %267 = vst.msk [vmem:[#allocation3] sm:$0xff] (!%p191_p3), %vm265_vm2, %v1234_v0  ;;  %v278_v5 = vlaneseq (!%p191_p3)  ;;  %v1237_v15 = vmov (!%p191_p3), 0   ;;  %s1239_s24 = smov (!%p191_p3), 112  }
   0x8   : > { %1085 = vmatprep.subr.bf16.mxu1 (!%p191_p3), %v1234_v0  ;;  %1087 = vmatprep.mubr.msk.bf16.mxu1 (!%p191_p3), %vm1235_vm0, %v1234_v0  ;;  %266 = vst.msk [vmem:[#allocation2] sm:$0xff] (!%p191_p3), %vm265_vm2, %v1236_v4  ;;  %s1240_s25 = smov (!%p191_p3), 104   ;;  %vm361_vm4 = vcmask (!%p191_p3), 7168   ;;  %vm374_vm5 = vcmask (!%p191_p3), 1043456   ;;  %v1241_v4 = vmov (!%p191_p3), 1   ;;  %vm504_vm6 = vcmask (!%p191_p3), 15368  }
   0x9   : > { %v1313_v6 = vshrl.u32 (!%p191_p3), %v278_v5, 7  ;;  %v1315_v7 = vand.u32 (!%p191_p3), 127, %v278_v5  ;;  %1164 = vset.pattern.permute.xlu0 (!%p191_p3), %v1237_v15  ;;  %1165 = vset.pattern.permute.xlu1 (!%p191_p3), %v1241_v4  ;;  %v1242_v5 = vmov (!%p191_p3), 2   ;;  %vm268_vm7 = vcmask (!%p191_p3), 261120   ;;  %s1244_s29 = smov (!%p191_p3), 8   ;;  %s1245_s30 = smov (!%p191_p3), 16  }
   0xa   : > { %vm656_vm8 = vcmask (!%p191_p3), 23568   ;;  %269 = vst.msk [vmem:[#allocation4] sm:$0xff] (!%p191_p3), %vm268_vm7, %v1234_v0  ;;  %vm808_vm9 = vcmask (!%p191_p3), 31768   ;;  %s1246_s4 = smov (!%p191_p3), 24   ;;  %vm570_vm10 = vcmask (!%p191_p3), 130112   ;;  %vm722_vm11 = vcmask (!%p191_p3), 195712  }
   0xb   : > { %vm286_vm3 = vcmp.le.s32.totalorder (!%p191_p3), %v1315_v7, %v1313_v6  ;;  %vm874_vm12 = vcmask (!%p191_p3), 261312   ;;  %vm890_vm13 = vcmask (!%p191_p3), 60416   ;;  %vm902_vm14 = vcmask (!%p191_p3), 126016  }
   0xc   : > { %vm914_vm15 = vcmask (!%p191_p3), 191616  }
   0xe   : > { %s1495_s12 = smov (!%p232_p4, %s1224_s12), 1 }
   0xf   : > { %s1291_s16 = sshll.u32 %s1495_s12, 2  ;;  %v1336_v22 = vld [vmem:[#allocation2] sm:$0xff] }
  0x10   : > { %s1297_s19 = scalar_lea.vmem %s1487_s1, %s1291_s16  ;;  %s1304_s22 = scalar_lea.vmem %s1486_s0, %s1291_s16 }
  0x11   : > { %v288_v1 = vld [vmem:[%s1297_s19] sm:$0xf]  ;;  %s1350_s28 = scalar_lea.vmem %s1488_s2, %s1291_s16  ;;  %s259_s7 = scalar_lea.vmem %s1489_s3, %s1291_s16 }
  0x12   : > { %v295_v2 = vsel %vm290_vm1, %v288_v1, 0  ;;  %v287_v3 = vld [vmem:[%s1304_s22] sm:$0xf] }
  0x13   : > { %1080 = vmatpush3.bf16.xpose.msra.mxu0 %v295_v2  ;;  %v1177_v16 = vld [vmem:[%s1297_s19] ss:$0 sps:$4 sm:$0xff]  }
  0x14   : > { %1097 = vmatprep.subr.bf16.mxu0 %v1234_v0  ;;  %432 = vrot.lane.b32.xlu1 %v1177_v16, %s1238_s23  ;;  %v1178_v17 = vld [vmem:[%s1304_s22] ss:$0 sps:$4 sm:$0xff]  }
  0x15   : > { %v1179_v18 = vld [vmem:[%s1297_s19] ss:$0 sps:$4 sm:$0xff]  }
  0x16   : > { %v1180_v19 = vld [vmem:[%s1304_s22] ss:$0 sps:$4 sm:$0xff]  }
  0x17   : > { %v1181_v20 = vld [vmem:[%s1297_s19] ss:$0 sps:$4 sm:$0xff]  }
  0x18   : > { %427 = vrot.lane.b32.xlu1 %v1178_v17, %s1238_s23  ;;  %v1182_v21 = vld [vmem:[%s1304_s22] ss:$0 sps:$4 sm:$0xff]  }
  0x19   : > { %v289_v26 = vld [vmem:[%s1350_s28] sm:$0xf] }
  0x1a   : > { %1082 = vmatmul.mubr.msk.bf16.vlgmr.msra.gmra.mrb[0].mxu0 %vm290_vm1, %v287_v3  ;;  %v376_v27 = vsel %vm374_vm5, %v289_v26, 0 }
  0x1b   : > { %1099 = vmatprep.mubr.msk.bf16.mxu0 %vm1235_vm0, %v1234_v0  ;;  %1086 = vmatpush3.bf16.msra.mxu1 %v376_v27 }
  0x1c   : > { %584 = vrot.lane.b32.xlu1 %v1179_v18, %s1239_s24  ;;  %1091 = vmatprep.subr.bf16.mxu1 %v1234_v0 }
  0x20   : > { %579 = vrot.lane.b32.xlu1 %v1180_v19, %s1239_s24 }
  0x24   : > { %736 = vrot.lane.b32.xlu1 %v1181_v20, %s1240_s25 }
  0x28   : > { %731 = vrot.lane.b32.xlu1 %v1182_v21, %s1240_s25 }
  0x86   : > { %v433_v31 = vpop.permute.xlu1 %432 }
  0x87   : > { %v438_v34 = vsel %vm290_vm1, %v433_v31, 0 }
  0x8a   : > { %v428_v32 = vpop.permute.xlu1 %427 }
  0x8e   : > { %v585_v36 = vpop.permute.xlu1 %584 }
  0x8f   : > { %v590_v38 = vsel %vm290_vm1, %v585_v36, 0  ;;  %v363_v36 = vld [vmem:[#allocation4] sm:$0xff] }
  0x92   : > { %v580_v37 = vpop.permute.xlu1 %579 }
  0x96   : > { %v737_v39 = vpop.permute.xlu1 %736 }
  0x97   : > { %v742_v40 = vsel %vm290_vm1, %v737_v39, 0 }
  0x9a   : > { %v732_v41 = vpop.permute.xlu1 %731 }
  0xed   : > { %v331_v8 = vpop.f32.mrb[0].mxu0 }
  0xee   : > { %v337_v9 = vmul.f32 0.35355338, %v331_v8  ;;  %v1083_v10 = vpop.f32.mrb[1].mxu0 }
  0xef   : > { %v334_v11 = vpop.f32.mrb[2].mxu0 }
  0xf0   : > { %v1084_v12 = vpop.f32.mrb[3].mxu0  ;;  %v338_v13 = vsel %vm286_vm3, %v337_v9, -1e+30  ;;  %v1183_v11 = vld [vmem:[%s1350_s28] ss:$0 sps:$4 sm:$0xff]  }
  0xf1   : > { %v341_v14 = vsel %vm290_vm1, %v338_v13, -inf  ;;  %v1243_v12 = vmov 3  }
  0xf2   : > { %342 = vmax.xlane.f32.xlu0 %v341_v14 }
 0x17f   : > { %v343_v23 = vpop.xlane.xlu0 %342 }
 0x180   : > { %v1339_v24 = vmax.f32 %v1336_v22, %v343_v23  ;;  %v1184_v23 = vld [vmem:[%s1350_s28] ss:$0 sps:$4 sm:$0xff]  }
 0x182   : > { %v345_v25 = vsub.f32 %v1336_v22, %v1339_v24  ;;  %420 = vst.msk [vmem:[#allocation2] sm:$0xff] %vm361_vm4, %v1339_v24  ;;  %350 = vperm.xlu0 %1164, %v1339_v24   ;;  %v1185_v24 = vld [vmem:[%s1350_s28] ss:$0 sps:$4 sm:$0xff]  }
 0x184   : > { %v346_v6 = vmul.f32 1.442695, %v345_v25 }
 0x186   : > { %1166 = vset.pattern.permute.xlu0 %v1242_v5 }
 0x189   : > { %v482_v9 = vld [vmem:[#allocation2] sm:$0xff] }
 0x201   : > { %v351_v28 = vpop.permute.xlu0 %350 }
 0x202   : > { %v353_v29 = vsub.f32 %v338_v13, %v351_v28 }
 0x204   : > { %v354_v30 = vmul.f32 1.442695, %v353_v29 }
 0x206   : > { %1186 = vpow2.f32 %v354_v30 }
 0x207   : > { %1188 = vpow2.f32 %v346_v6 }
 0x210   : > { %v1355_v33 = vpop.eup %1186 }
 0x211   : > { %v370_v35 = vpack.c.bf16 %v1355_v33, %v1355_v33  ;;  %v1417_v18 = vpop.eup %1188  ;;  %v357_v25 = vsel %vm290_vm1, %v1355_v33, 0.0 }
 0x213   : > { %1088 = vmatmul.mubr.msk.bf16.vlgmr.msra.gmra.mrb[0].mxu1 %vm290_vm1, %v370_v35 }
 0x214   : > { %1092 = vmatpush3.bf16.xpose.msra.mxu1 %v438_v34  ;;  %1093 = vmatprep.mubr.msk.bf16.mxu1 %vm1235_vm0, %v1234_v0 }
 0x215   : > { %1103 = vmatprep.subr.bf16.mxu1 %v1234_v0 }
 0x21b   : > { %1094 = vmatmul.mubr.msk.bf16.vlgmr.msra.gmra.mrb[4].mxu1 %vm290_vm1, %v428_v32 }
 0x21c   : > { %1104 = vmatpush3.bf16.xpose.msra.mxu1 %v590_v38  ;;  %1105 = vmatprep.mubr.msk.bf16.mxu1 %vm1235_vm0, %v1234_v0 }
 0x21d   : > { %1115 = vmatprep.subr.bf16.mxu1 %v1234_v0 }
 0x223   : > { %1106 = vmatmul.mubr.msk.bf16.vlgmr.msra.gmra.mrb[8].mxu1 %vm290_vm1, %v580_v37 }
 0x224   : > { %1116 = vmatpush3.bf16.xpose.msra.mxu1 %v742_v40  ;;  %1117 = vmatprep.mubr.msk.bf16.mxu1 %vm1235_vm0, %v1234_v0 }
 0x22b   : > { %1118 = vmatmul.mubr.msk.bf16.vlgmr.msra.gmra.mrb[12].mxu1 %vm290_vm1, %v732_v41 }
 0x2e6   : > { %v1374_v42 = vpop.f32.mrb[0].mxu1 }
 0x2e7   : > { %v1089_v43 = vpop.f32.mrb[1].mxu1 }
 0x2e8   : > { %v415_v44 = vpop.f32.mrb[2].mxu1 }
 0x2e9   : > { %v1090_v45 = vpop.f32.mrb[3].mxu1 }
 0x2ee   : > { %v474_v46 = vpop.f32.mrb[4].mxu1 }
 0x2ef   : > { %v480_v47 = vmul.f32 0.35355338, %v474_v46  ;;  %v1095_v48 = vpop.f32.mrb[5].mxu1 }
 0x2f0   : > { %v477_v49 = vpop.f32.mrb[6].mxu1 }
 0x2f1   : > { %v1096_v50 = vpop.f32.mrb[7].mxu1  ;;  %v1379_v51 = vsel %vm286_vm3, %v480_v47, -1e+30 }
 0x2f2   : > { %v484_v52 = vsel %vm290_vm1, %v1379_v51, -inf }
 0x2f3   : > { %485 = vmax.xlane.f32.xlu1 %v484_v52 }
 0x2f6   : > { %v626_v53 = vpop.f32.mrb[8].mxu1 }
 0x2f7   : > { %v632_v54 = vmul.f32 0.35355338, %v626_v53  ;;  %v1107_v55 = vpop.f32.mrb[9].mxu1 }
 0x2f8   : > { %v629_v56 = vpop.f32.mrb[10].mxu1 }
 0x2f9   : > { %v1108_v57 = vpop.f32.mrb[11].mxu1  ;;  %v1386_v58 = vsel %vm286_vm3, %v632_v54, -1e+30 }
 0x2fa   : > { %v636_v59 = vsel %vm290_vm1, %v1386_v58, -inf }
 0x2fb   : > { %637 = vmax.xlane.f32.xlu0 %v636_v59 }
 0x2fe   : > { %v778_v60 = vpop.f32.mrb[12].mxu1 }
 0x2ff   : > { %v784_v61 = vmul.f32 0.35355338, %v778_v60  ;;  %v1119_v62 = vpop.f32.mrb[13].mxu1 }
 0x300   : > { %v781_v63 = vpop.f32.mrb[14].mxu1 }
 0x301   : > { %v1120_v1 = vpop.f32.mrb[15].mxu1  ;;  %v1393_v2 = vsel %vm286_vm3, %v784_v61, -1e+30 }
 0x302   : > { %v788_v3 = vsel %vm290_vm1, %v1393_v2, -inf }
 0x303   : > { %789 = vmax.xlane.f32.xlu1 %v788_v3 }
 0x380   : > { %v486_v8 = vpop.xlane.xlu1 %485 }
 0x381   : > { %v487_v10 = vmax.f32 %v482_v9, %v486_v8 }
 0x383   : > { %v488_v7 = vsub.f32 %v482_v9, %v487_v10  ;;  %572 = vst.msk [vmem:[#allocation2] sm:$0xff] %vm504_vm6, %v487_v10  ;;  %493 = vperm.xlu1 %1165, %v487_v10  }
 0x385   : > { %v489_v26 = vmul.f32 1.442695, %v488_v7 }
 0x387   : > { %517 = vrot.lane.b32.xlu1 %v1183_v11, %s1238_s23  ;;  %1190 = vpow2.f32 %v489_v26 }
 0x388   : > { %1167 = vset.pattern.permute.xlu1 %v1243_v12  ;;  %v638_v13 = vpop.xlane.xlu0 %637 }
 0x38a   : > { %v1406_v14 = vld [vmem:[#allocation2] sm:$0xff] }
 0x38b   : > { %v1410_v16 = vmax.f32 %v1406_v14, %v638_v13 }
 0x38d   : > { %v640_v17 = vsub.f32 %v1406_v14, %v1410_v16  ;;  %724 = vst.msk [vmem:[#allocation2] sm:$0xff] %vm656_vm8, %v1410_v16  ;;  %645 = vperm.xlu0 %1166, %v1410_v16  }
 0x38f   : > { %v641_v52 = vmul.f32 1.442695, %v640_v17 }
 0x390   : > { %v790_v19 = vpop.xlane.xlu1 %789 }
 0x391   : > { %1168 = vset.pattern.permute.xlu0 %v1237_v15  ;;  %v1191_v27 = vpop.eup %1190 }
 0x392   : > { %366 = vperm.xlu0 %1168, %v1417_v18  }
 0x394   : > { %v1421_v20 = vld [vmem:[#allocation2] sm:$0xff] }
 0x395   : > { %v1424_v21 = vmax.f32 %v1421_v20, %v790_v19 }
 0x396   : > { %1171 = vset.pattern.permute.xlu0 %v1243_v12 }
 0x397   : > { %v792_v22 = vsub.f32 %v1421_v20, %v1424_v21  ;;  %876 = vst.msk [vmem:[#allocation2] sm:$0xff] %vm808_vm9, %v1424_v21  ;;  %797 = vperm.xlu1 %1167, %v1424_v21  }
 0x39b   : > { %669 = vrot.lane.b32.xlu1 %v1184_v23, %s1239_s24 }
 0x39c   : > { %1169 = vset.pattern.permute.xlu1 %v1241_v4 }
 0x39f   : > { %821 = vrot.lane.b32.xlu1 %v1185_v24, %s1240_s25 }
 0x3c3   : > { %358 = vadd.xlane.f32.xlu1 %v357_v25 }
 0x3d4   : > { %509 = vperm.xlu1 %1169, %v1191_v27  }
 0x3d8   : > { %1170 = vset.pattern.permute.xlu1 %v1242_v5 }
 0x402   : > { %v494_v28 = vpop.permute.xlu1 %493 }
 0x403   : > { %v496_v29 = vsub.f32 %v1379_v51, %v494_v28 }
 0x405   : > { %v497_v30 = vmul.f32 1.442695, %v496_v29 }
 0x406   : > { %v518_v31 = vpop.permute.xlu1 %517 }
 0x407   : > { %1192 = vpow2.f32 %v497_v30  ;;  %v523_v32 = vsel %vm374_vm5, %v518_v31, 0 }
 0x408   : > { %1098 = vmatpush3.bf16.msra.mxu0 %v523_v32 }
 0x409   : > { %1109 = vmatprep.subr.bf16.mxu0 %v1234_v0 }
 0x40c   : > { %v646_v34 = vpop.permute.xlu0 %645 }
 0x40d   : > { %v648_v33 = vsub.f32 %v1386_v58, %v646_v34  ;;  %v340_v58 = vld [vmem:[#allocation3] sm:$0xff] }
 0x40e   : > { %v356_v59 = vmul.f32 %v1417_v18, %v340_v58 }
 0x40f   : > { %v649_v35 = vmul.f32 1.442695, %v648_v33 }
 0x411   : > { %v1193_v37 = vpop.eup %1192  ;;  %1194 = vpow2.f32 %v649_v35  ;;  %v367_v38 = vpop.permute.xlu0 %366 }
 0x412   : > { %v369_v39 = vmul.f32 %v367_v38, %v363_v36  ;;  %v500_v40 = vsel %vm290_vm1, %v1193_v37, 0.0  ;;  %v513_v41 = vpack.c.bf16 %v1193_v37, %v1193_v37 }
 0x413   : > { %501 = vadd.xlane.f32.xlu0 %v500_v40 }
 0x414   : > { %v418_v43 = vadd.f32 %v1374_v42, %v369_v39  ;;  %1100 = vmatmul.mubr.msk.bf16.vlgmr.msra.gmra.mrb[4].mxu0 %vm290_vm1, %v513_v41 }
 0x415   : > { %1111 = vmatprep.mubr.msk.bf16.mxu0 %vm1235_vm0, %v1234_v0 }
 0x416   : > { %419 = vst.msk [vmem:[#allocation4] sm:$0xff] %vm290_vm1, %v418_v43  ;;  %v798_v44 = vpop.permute.xlu1 %797 }
 0x417   : > { %v800_v45 = vsub.f32 %v1393_v2, %v798_v44  ;;  %v793_v2 = vmul.f32 1.442695, %v792_v22 }
 0x419   : > { %v801_v46 = vmul.f32 1.442695, %v800_v45 }
 0x41a   : > { %v670_v47 = vpop.permute.xlu1 %669 }
 0x41b   : > { %v1195_v48 = vpop.eup %1194  ;;  %1196 = vpow2.f32 %v801_v46  ;;  %v675_v49 = vsel %vm374_vm5, %v670_v47, 0 }
 0x41c   : > { %1110 = vmatpush3.bf16.msra.mxu0 %v675_v49  ;;  %v652_v50 = vsel %vm290_vm1, %v1195_v48, 0.0  ;;  %v665_v42 = vpack.c.bf16 %v1195_v48, %v1195_v48  ;;  %1198 = vpow2.f32 %v641_v52 }
 0x41d   : > { %653 = vadd.xlane.f32.xlu1 %v652_v50  ;;  %1121 = vmatprep.subr.bf16.mxu0 %v1234_v0  ;;  %1200 = vpow2.f32 %v793_v2  ;;  %v506_v28 = vld [vmem:[#allocation4] sm:$0xff] }
 0x41e   : > { %v822_v51 = vpop.permute.xlu1 %821 }
 0x41f   : > { %1112 = vmatmul.mubr.msk.bf16.vlgmr.msra.gmra.mrb[8].mxu0 %vm290_vm1, %v665_v42  ;;  %v827_v53 = vsel %vm374_vm5, %v822_v51, 0 }
 0x420   : > { %1122 = vmatpush3.bf16.msra.mxu0 %v827_v53  ;;  %1123 = vmatprep.mubr.msk.bf16.mxu0 %vm1235_vm0, %v1234_v0  ;;  %vm926_vm0 = vcmask 257216  }
 0x425   : > { %v1197_v54 = vpop.eup %1196 }
 0x426   : > { %v804_v55 = vsel %vm290_vm1, %v1197_v54, 0.0  ;;  %v817_v56 = vpack.c.bf16 %v1197_v54, %v1197_v54  ;;  %v1199_v57 = vpop.eup %1198 }
 0x427   : > { %805 = vadd.xlane.f32.xlu0 %v804_v55  ;;  %v1201_v6 = vpop.eup %1200 }
 0x428   : > { %1124 = vmatmul.mubr.msk.bf16.vlgmr.msra.gmra.mrb[12].mxu0 %vm290_vm1, %v817_v56 }
 0x42e   : > { %661 = vperm.xlu1 %1170, %v1199_v57  }
 0x432   : > { %1172 = vset.pattern.permute.xlu1 %v1237_v15 }
 0x450   : > { %v359_v60 = vpop.xlane.xlu1 %358 }
 0x451   : > { %v360_v61 = vadd.f32 %v359_v60, %v356_v59 }
 0x453   : > { %362 = vst.msk [vmem:[#allocation3] sm:$0xff] %vm361_vm4, %v360_v61 }
 0x454   : > { %v510_v3 = vpop.permute.xlu1 %509 }
 0x455   : > { %v512_v29 = vmul.f32 %v510_v3, %v506_v28 }
 0x45a   : > { %v483_v0 = vld [vmem:[#allocation3] sm:$0xff] }
 0x45b   : > { %v499_v62 = vmul.f32 %v1191_v27, %v483_v0 }
 0x4a0   : > { %v502_v63 = vpop.xlane.xlu0 %501 }
 0x4a1   : > { %v503_v1 = vadd.f32 %v502_v63, %v499_v62 }
 0x4a3   : > { %505 = vst.msk [vmem:[#allocation3] sm:$0xff] %vm504_vm6, %v503_v1 }
 0x4aa   : > { %v635_v8 = vld [vmem:[#allocation3] sm:$0xff]  ;;  %v654_v9 = vpop.xlane.xlu1 %653 }
 0x4ab   : > { %v651_v15 = vmul.f32 %v1199_v57, %v635_v8 }
 0x4ad   : > { %v655_v10 = vadd.f32 %v654_v9, %v651_v15 }
 0x4ae   : > { %v662_v34 = vpop.permute.xlu1 %661 }
 0x4af   : > { %657 = vst.msk [vmem:[#allocation3] sm:$0xff] %vm656_vm8, %v655_v10 }
 0x4b4   : > { %v806_v13 = vpop.xlane.xlu0 %805 }
 0x4b6   : > { %v787_v7 = vld [vmem:[#allocation3] sm:$0xff] }
 0x4b7   : > { %v803_v11 = vmul.f32 %v1201_v6, %v787_v7 }
 0x4b9   : > { %v807_v14 = vadd.f32 %v806_v13, %v803_v11 }
 0x4bb   : > { %809 = vst.msk [vmem:[#allocation3] sm:$0xff] %vm808_vm9, %v807_v14 }
 0x4c2   : > { %v881_v16 = vld [vmem:[#allocation3] sm:$0xff] }
 0x4c3   : > { %884 = vperm.xlu1 %1172, %v881_v16  }
 0x4c7   : > { %1174 = vset.pattern.permute.xlu1 %v1242_v5 }
 0x4c8   : > { %908 = vperm.xlu1 %1174, %v881_v16  }
 0x4cc   : > { %1175 = vset.pattern.permute.xlu1 %v1243_v12 }
 0x4cd   : > { %920 = vperm.xlu1 %1175, %v881_v16  }
 0x4e7   : > { %v559_v17 = vpop.f32.mrb[4].mxu0 }
 0x4e8   : > { %566 = vrot.lane.b32.xlu0 %v559_v17, %s1244_s29  ;;  %v1101_v18 = vpop.f32.mrb[5].mxu0 }
 0x4e9   : > { %v562_v19 = vpop.f32.mrb[6].mxu0 }
 0x4ea   : > { %v1102_v20 = vpop.f32.mrb[7].mxu0 }
 0x4ec   : > { %813 = vperm.xlu0 %1171, %v1201_v6  }
 0x4f0   : > { %1173 = vset.pattern.permute.xlu0 %v1241_v4 }
 0x4f2   : > { %v711_v21 = vpop.f32.mrb[8].mxu0 }
 0x4f3   : > { %718 = vrot.lane.b32.xlu0 %v711_v21, %s1245_s30  ;;  %v1113_v22 = vpop.f32.mrb[9].mxu0 }
 0x4f4   : > { %v714_v23 = vpop.f32.mrb[10].mxu0 }
 0x4f5   : > { %v1114_v24 = vpop.f32.mrb[11].mxu0 }
 0x4fb   : > { %v863_v5 = vpop.f32.mrb[12].mxu0 }
 0x4fc   : > { %870 = vrot.lane.b32.xlu0 %v863_v5, %s1246_s4  ;;  %v1125_v25 = vpop.f32.mrb[13].mxu0 }
 0x4fd   : > { %v866_v26 = vpop.f32.mrb[14].mxu0 }
 0x4fe   : > { %v1126_v27 = vpop.f32.mrb[15].mxu0 }
 0x500   : > { %896 = vperm.xlu0 %1173, %v881_v16  }
 0x504   : > { %1176 = vset.pattern.permute.xlu0 %v1243_v12 }
 0x542   : > { %v885_v36 = vpop.permute.xlu1 %884 }
 0x543   : > { %1202 = vrcp.f32 %v885_v36 }
 0x547   : > { %v909_v38 = vpop.permute.xlu1 %908 }
 0x548   : > { %1204 = vrcp.f32 %v909_v38 }
 0x54c   : > { %v921_v41 = vpop.permute.xlu1 %920 }
 0x54d   : > { %1206 = vrcp.f32 %v921_v41  ;;  %v1203_v45 = vpop.eup %1202 }
 0x552   : > { %v1205_v48 = vpop.eup %1204 }
 0x557   : > { %v1207_v50 = vpop.eup %1206 }
 0x55a   : > { %v567_v30 = vpop.permute.xlu0 %566 }
 0x55b   : > { %v569_v4 = vadd.f32 %v567_v30, %v512_v29 }
 0x55d   : > { %571 = vst.msk [vmem:[#allocation4] sm:$0xff] %vm570_vm10, %v569_v4 }
 0x564   : > { %v658_v32 = vld [vmem:[#allocation4] sm:$0xff] }
 0x565   : > { %v664_v33 = vmul.f32 %v662_v34, %v658_v32 }
 0x56b   : > { %v814_v31 = vpop.permute.xlu0 %813 }
 0x56f   : > { %v719_v35 = vpop.permute.xlu0 %718 }
 0x570   : > { %v721_v37 = vadd.f32 %v719_v35, %v664_v33 }
 0x572   : > { %723 = vst.msk [vmem:[#allocation4] sm:$0xff] %vm722_vm11, %v721_v37 }
 0x573   : > { %v871_v12 = vpop.permute.xlu0 %870 }
 0x579   : > { %v810_v39 = vld [vmem:[#allocation4] sm:$0xff] }
 0x57a   : > { %v816_v40 = vmul.f32 %v814_v31, %v810_v39 }
 0x57c   : > { %v873_v43 = vadd.f32 %v871_v12, %v816_v40 }
 0x57e   : > { %875 = vst.msk [vmem:[#allocation4] sm:$0xff] %vm874_vm12, %v873_v43 }
 0x57f   : > { %v897_v44 = vpop.permute.xlu0 %896 }
 0x580   : > { %1208 = vrcp.f32 %v897_v44 }
 0x585   : > { %v880_v46 = vld [vmem:[#allocation4] sm:$0xff] }
 0x586   : > { %v888_v47 = vmul.f32 %v1203_v45, %v880_v46  ;;  %v912_v51 = vmul.f32 %v1205_v48, %v880_v46  ;;  %v924_v52 = vmul.f32 %v1207_v50, %v880_v46 }
 0x588   : > { %v889_v49 = vpack.c.bf16 %v888_v47, %v888_v47  ;;  %v913_v55 = vpack.c.bf16 %v912_v51, %v912_v51  ;;  %v925_v56 = vpack.c.bf16 %v924_v52, %v924_v52 }
 0x58a   : > { %v1209_v42 = vpop.eup %1208  ;;  %891 = vst.msk [vmem:[%s259_s7] sm:$0xf] %vm890_vm13, %v889_v49 }
 0x58b   : > { %v900_v53 = vmul.f32 %v1209_v42, %v880_v46 }
 0x58d   : > { %v901_v54 = vpack.c.bf16 %v900_v53, %v900_v53 }
 0x58f   : > { %903 = vst.msk [vmem:[%s259_s7] sm:$0xf] %vm902_vm14, %v901_v54 }
 0x590   : > { %915 = vst.msk [vmem:[%s259_s7] sm:$0xf] %vm914_vm15, %v913_v55 }
 0x591   : > { %927 = vst.msk [vmem:[%s259_s7] sm:$0xf] %vm926_vm0, %v925_v56 }
 0x592 PF: > { %s13_s14 = sadd.s32 1, %s1232_s14   ;;  %s1490_s12 = smov %s1228_s13 }
 0x593   : > { %p10_p5 = scmp.ge.s32.totalorder %s13_s14, 4   ;;  %s1491_s13 = smov %s1493_s15 }
 0x595   :  { %12 = sbr.rel (!%p10_p5) target bundleno = 2 (0x2), region = 80 }

// kernel: gpt_forward.21
= control target key start
LH: loop header
LB: loop body
LE: loop exit
PB: predicated region body
PF: predicated region fallthrough
CT: control target
= control target key end

     0   :  { %vm32_vm0 = vcmask 261120   ;;  %s309_s0 = inlined_call_operand.vmem [shape: bf16[16,32], index: 0, kind: input, shape index: {}]   ;;  %s310_s1 = inlined_call_operand.vmem [shape: f32[1,32], index: 1, kind: input, shape index: {}]   ;;  %s311_s2 = inlined_call_operand.vmem [shape: f32[1,32], index: 2, kind: input, shape index: {}]   ;;  %s312_s3 = inlined_call_operand.vmem [shape: bf16[32,128], index: 3, kind: input, shape index: {}]   ;;  %s313_s4 = inlined_call_operand.vmem [shape: f32[1,128], index: 4, kind: input, shape index: {}]   ;;  %s314_s5 = inlined_call_operand.hbm [shape: bf16[16,128], index: 5, kind: output, shape index: {}]  }
   0x1   :  { %v184_v0 = vld [vmem:[%s309_s0] sm:$0xff]  }
   0x2   :  { %v185_v1 = vunpack.c.l.bf16 %v184_v0  ;;  %v186_v2 = vunpack.c.h.bf16 %v184_v0 }
   0x3   :  { %10 = vsyncpa [#allocation4], 0  ;;  %v208_v15 = vld [vmem:[%s312_s3] sm:$0xff]   ;;  %v238_v16 = vmov 0.0   ;;  %v209_v17 = vld [vmem:[%s312_s3 + $0x8] sm:$0xff]   ;;  %vm239_vm1 = vmmov 0  }
   0x4   :  { %v33_v3 = vsel %vm32_vm0, %v185_v1, 0.0  ;;  %v36_v4 = vsel %vm32_vm0, %v186_v2, 0.0  ;;  %195 = vmatprep.subr.bf16.mxu0 %v238_v16  ;;  %199 = vmatprep.mubr.msk.bf16.mxu0 %vm239_vm1, %v238_v16  ;;  %v173_v26 = vld [vmem:[%s310_s1] ss:$0 sm:$0xff]  ;;  %s240_s1 = smov [#allocation3]  }
   0x5   :  { %34 = vadd.xlane.f32.xlu0 %v33_v3  ;;  %196 = vmatpush3.bf16.msra.mxu0 %v208_v15  ;;  %v174_v30 = vld [vmem:[%s311_s2] ss:$0 sm:$0xff]  ;;  %s162_s28 = sshll.u32 %s240_s1, 4  ;;  %s163_s28 = int_to_ptr.vmem [resolvable:$true] %s162_s28 }
   0x6   :  { %197 = vmatprep.subr.bf16.mxu0 %v238_v16  ;;  %v175_v36 = vld [vmem:[%s313_s4] ss:$0 sm:$0xff]  ;;  %s214_s2 = scalar_lea.vmem %s163_s28, 128  ;;  %p219_p1 = scmp.lt.s32.totalorder %s163_s28, %s163_s28 }
   0x7   :  { %p215_p0 = scmp.ne.s32.totalorder %s163_s28, %s214_s2  ;;  %p220_p2 = scmp.lt.s32.totalorder %s214_s2, %s214_s2 }
   0x9   :  { %37 = vadd.xlane.f32.xlu0 %v36_v4  ;;  %198 = vmatpush3.bf16.msra.mxu0 %v209_v17  ;;  %p221_p3 = por %p220_p2, %p219_p1 }
   0xb   :  { %p222_p4 = pnand %p221_p3, %p215_p0 }
  0x92   :  { %v35_v5 = vpop.xlane.xlu0 %34 }
  0x93   :  { %v40_v6 = vmul.f32 0.03125, %v35_v5 }
  0x95   :  { %v42_v7 = vsub.f32 %v185_v1, %v40_v6 }
  0x96   :  { %v38_v8 = vpop.xlane.xlu0 %37 }
  0x97   :  { %v41_v9 = vmul.f32 0.03125, %v38_v8  ;;  %v44_v10 = vmul.f32 %v42_v7, %v42_v7 }
  0x99   :  { %v43_v11 = vsub.f32 %v186_v2, %v41_v9  ;;  %v46_v12 = vsel %vm32_vm0, %v44_v10, 0.0 }
  0x9a   :  { %47 = vadd.xlane.f32.xlu1 %v46_v12 }
  0x9b   :  { %v45_v13 = vmul.f32 %v43_v11, %v43_v11 }
  0x9d   :  { %v49_v14 = vsel %vm32_vm0, %v45_v13, 0.0 }
  0x9e   :  { %50 = vadd.xlane.f32.xlu1 %v49_v14 }
 0x127   :  { %v48_v18 = vpop.xlane.xlu1 %47 }
 0x128   :  { %v52_v19 = vmul.f32 0.03125, %v48_v18 }
 0x12a   :  { %v54_v20 = vadd.f32 1e-05, %v52_v19 }
 0x12b   :  { %v51_v21 = vpop.xlane.xlu1 %50 }
 0x12c   :  { %210 = vrsqrt.f32 %v54_v20  ;;  %v53_v22 = vmul.f32 0.03125, %v51_v21 }
 0x12e   :  { %v55_v23 = vadd.f32 1e-05, %v53_v22 }
 0x130   :  { %212 = vrsqrt.f32 %v55_v23 }
 0x136   :  { %v211_v24 = vpop.eup %210 }
 0x137   :  { %v58_v25 = vmul.f32 %v211_v24, %v42_v7 }
 0x139   :  { %v66_v28 = vmul.f32 %v173_v26, %v58_v25 }
 0x13a   :  { %v213_v27 = vpop.eup %212 }
 0x13b   :  { %v59_v29 = vmul.f32 %v213_v27, %v43_v11  ;;  %v74_v32 = vadd.f32 %v174_v30, %v66_v28 }
 0x13d   :  { %v67_v31 = vmul.f32 %v173_v26, %v59_v29 }
 0x13f   :  { %v75_v33 = vadd.f32 %v174_v30, %v67_v31 }
 0x141   :  { %v76_v34 = vpack.c.bf16 %v75_v33, %v74_v32 }
 0x143   :  { %77 = vst.msk [vmem:[#allocation2] sm:$0xff] %vm32_vm0, %v76_v34 }
 0x14a   :  { %v78_v35 = vld [vmem:[#allocation2] sm:$0xff] }
 0x14b   :  { %200 = vmatmul.mubr.msk.bf16.vlgmr.msra.gmra.mrb[0].mxu0 %vm32_vm0, %v78_v35 }
 0x21e   :  { %v140_v37 = vpop.f32.mrb[0].mxu0 }
 0x21f   :  { %v201_v38 = vpop.f32.mrb[1].mxu0  ;;  %v141_v40 = vadd.f32 %v175_v36, %v140_v37 }
 0x220   :  { %v143_v39 = vpop.f32.mrb[2].mxu0 }
 0x221   :  { %v144_v41 = vadd.f32 %v175_v36, %v143_v39  ;;  %v202_v42 = vpop.f32.mrb[3].mxu0 }
 0x223   :  { %v190_v43 = vpack.c.bf16 %v144_v41, %v141_v40 }
 0x225   :  { %191 = vst [vmem:[#allocation3] sm:$0xff] %v190_v43  }
 0x226   :  { %225 = shalt.err (!%p222_p4)
}
 0x227   :  { %s226_s30 = scalar_lea.hbm %s314_s5, 128 }
 0x228   :  { %p227_p5 = scmp.ne.s32.totalorder %s314_s5, %s226_s30  ;;  %p230_p6 = scmp.lt.u32.totalorder %s226_s30, %s314_s5 }
 0x22a   :  { %p232_p7 = pnand %p230_p6, %p227_p5 }
 0x22c   :  { %235 = shalt.err (!%p232_p7)
}
 0x22d   :  { %s241_s10 = smov 64   ;;  %s242_s11 = smov 4  }
 0x22e   :  { %168 = dma.vmem_to_hbm [thread:$0]  %s163_s28, 128, %s314_s5, [#allocation4], %s241_s10, %s241_s10, %s242_s11  }
 0x22f   :  { %236 = dma.done.wait [#allocation4], 128  }
 0x230   :  { %237 = vsyncadd [#allocation4], 4294967168 }
 0x231   :  { %172 = vsyncpa [#allocation4], 1 }

// kernel: gpt_forward.15
= control target key start
LH: loop header
LB: loop body
LE: loop exit
PB: predicated region body
PF: predicated region fallthrough
CT: control target
= control target key end

     0   :  { %v236_v0 = vmov 0.0   ;;  %vm237_vm0 = vmmov 0   ;;  %vm35_vm1 = vcmask 261120   ;;  %vm171_vm2 = vcmask 257024   ;;  %s306_s1 = inlined_call_operand.vmem [shape: bf16[128,32], index: 1, kind: input, shape index: {}]   ;;  %s307_s2 = inlined_call_operand.vmem [shape: f32[1,32], index: 2, kind: input, shape index: {}]   ;;  %s308_s3 = inlined_call_operand.vmem [shape: bf16[16,32], index: 3, kind: input, shape index: {}]   ;;  %s309_s0 = inlined_call_operand.vmem [shape: bf16[16,128], index: 0, kind: input, shape index: {}]   ;;  %s310_s4 = inlined_call_operand.vmem [shape: bf16[16,32], index: 4, kind: output, shape index: {}]  }
   0x1   :  { %205 = vmatprep.subr.bf16.mxu0 %v236_v0  ;;  %v227_v1 = vld [vmem:[%s306_s1] sm:$0xff]   ;;  %221 = vmatprep.mubr.msk.bf16.mxu0 %vm237_vm0, %v236_v0  ;;  %v228_v2 = vld [vmem:[%s306_s1 + $0x8] sm:$0xff]   ;;  %v229_v3 = vld [vmem:[%s306_s1 + $0x10] sm:$0xff]  }
   0x2   :  { %206 = vmatpush3.bf16.msra.mxu0 %v227_v1  ;;  %v193_v4 = vld [vmem:[%s308_s3] sm:$0xff]   ;;  %v230_v6 = vld [vmem:[%s306_s1 + $0x18] sm:$0xff]   ;;  %v232_v10 = vld [vmem:[%s306_s1 + $0x28] sm:$0xff]  }
   0x3   :  { %207 = vmatprep.subr.bf16.mxu0 %v236_v0  ;;  %v178_v5 = vld [vmem:[%s307_s2] ss:$0 sm:$0xff]  ;;  %v194_v7 = vunpack.c.l.bf16 %v193_v4  ;;  %v233_v11 = vld [vmem:[%s306_s1 + $0x30] sm:$0xff]   ;;  %v234_v12 = vld [vmem:[%s306_s1 + $0x38] sm:$0xff]   ;;  %v195_v14 = vunpack.c.h.bf16 %v193_v4 }
   0x4   :  { %v231_v9 = vld [vmem:[%s306_s1 + $0x20] sm:$0xff]  }
   0x5   :  { %v33_v8 = vadd.f32 %v194_v7, %v178_v5  ;;  %v235_v13 = vld [vmem:[%s309_s0] sm:$0xff]   ;;  %v34_v15 = vadd.f32 %v195_v14, %v178_v5 }
   0x6   :  { %208 = vmatpush3.bf16.msra.mxu0 %v228_v2 }
   0x7   :  { %209 = vmatprep.subr.bf16.mxu0 %v236_v0  ;;  %36 = vst.msk [vmem:[#allocation2] sm:$0xff] %vm35_vm1, %v33_v8  ;;  %37 = vst.msk [vmem:[#allocation2 + $0x8] sm:$0xff] %vm35_vm1, %v34_v15 }
   0xa   :  { %210 = vmatpush3.bf16.msra.mxu0 %v229_v3 }
   0xb   :  { %211 = vmatprep.subr.bf16.mxu0 %v236_v0 }
   0xe   :  { %212 = vmatpush3.bf16.msra.mxu0 %v230_v6  ;;  %v38_v16 = vld [vmem:[#allocation2] sm:$0xff]  ;;  %v39_v18 = vld [vmem:[#allocation2 + $0x8] sm:$0xff] }
   0xf   :  { %213 = vmatprep.subr.bf16.mxu0 %v236_v0 }
  0x12   :  { %214 = vmatpush3.bf16.msra.mxu0 %v231_v9 }
  0x13   :  { %215 = vmatprep.subr.bf16.mxu0 %v236_v0 }
  0x16   :  { %216 = vmatpush3.bf16.msra.mxu0 %v232_v10 }
  0x17   :  { %217 = vmatprep.subr.bf16.mxu0 %v236_v0 }
  0x1a   :  { %218 = vmatpush3.bf16.msra.mxu0 %v233_v11 }
  0x1b   :  { %219 = vmatprep.subr.bf16.mxu0 %v236_v0 }
  0x1e   :  { %220 = vmatpush3.bf16.msra.mxu0 %v234_v12 }
  0x21   :  { %222 = vmatmul.mubr.bf16.vlgmr.msra.gmra.mrb[0].mxu0 %v235_v13 }
  0xf4   :  { %v146_v17 = vpop.f32.mrb[0].mxu0 }
  0xf5   :  { %v153_v19 = vadd.f32 %v146_v17, %v38_v16  ;;  %v223_v20 = vpop.f32.mrb[1].mxu0 }
  0xf6   :  { %v149_v21 = vpop.f32.mrb[2].mxu0 }
  0xf7   :  { %156 = vst.msk [vmem:[#allocation2] sm:$0xff] %vm35_vm1, %v153_v19  ;;  %v154_v22 = vadd.f32 %v149_v21, %v39_v18  ;;  %v224_v23 = vpop.f32.mrb[3].mxu0 }
  0xf9   :  { %157 = vst.msk [vmem:[#allocation2 + $0x8] sm:$0xff] %vm35_vm1, %v154_v22 }
  0xfe   :  { %v161_v24 = vld [vmem:[#allocation2] sm:$0xff] }
  0xff   :  { %v190_v25 = vpack.c.bf16 %v161_v24, %v161_v24 }
 0x100   :  { %v162_v26 = vld [vmem:[#allocation2 + $0x8] sm:$0xff] }
 0x101   :  { %172 = vst.msk [vmem:[%s310_s4] sm:$0xf] %vm171_vm2, %v190_v25  ;;  %v191_v27 = vpack.c.bf16 %v162_v26, %v162_v26 }
 0x103   :  { %173 = vst.msk [vmem:[%s310_s4 + $0x4] sm:$0xf] %vm171_vm2, %v191_v27 }

</bundles_post_ra>
